<compile_context>
chip_gen: v6e
topology: v6e:2x2x1
jax: 0.10.0
libtpu: 0.0.40
codegen_flags: <defaults>
</compile_context>

<pallas_src>
import functools

import jax
import jax.numpy as jnp
from jax.experimental import pallas as pl
from jax.experimental.pallas import tpu as pltpu

BN_EPS = 1e-5  # PyTorch BatchNorm1d default


def _round_up(x, m):
    return ((x + m - 1) // m) * m


def _head_kernel(ones_ref, x_ref, gamma_ref, beta_ref, wcls_ref,
                 cls_ref, gf_ref, sum_acc, *, inv_hw):
    """One (C-tile, HW-tile) grid step of GAP -> BatchNorm1d -> Linear.

    ones_ref:  [B, 8, tile_hw]      ones slab (x dtype), resident across the grid
    x_ref:     [B, tile_c, tile_hw] feature-map block (native dtype, e.g. bf16)
    gamma_ref: [1, tile_c]          BN weight slab (f32)
    beta_ref:  [1, tile_c]          BN bias slab (f32)
    wcls_ref:  [tile_c, NCp]        classifier weight slab (transposed, lane-padded, x dtype)
    cls_ref:   [1, B, NCp]          per-C-tile classifier partial (f32)
    gf_ref:    [B, tile_c]          global_feat output slab (f32, resident across HW tiles)
    sum_acc:   [B, 8, tile_c] f32   running spatial sum for the current C tile
    """
    hwi = pl.program_id(1)
    nhw = pl.num_programs(1)

    @pl.when(hwi == 0)
    def _():
        sum_acc[...] = jnp.zeros_like(sum_acc)

    # Partial global-average-pool on the MXU: contract the spatial (lane) axis of the
    # bf16 block against ones, f32 accumulate.  Keeps VPU/XLU idle -> purely DMA-bound.
    partial = jnp.einsum('bks,bcs->bkc', ones_ref[...], x_ref[...],
                         preferred_element_type=jnp.float32)
    sum_acc[...] += partial

    @pl.when(hwi == nhw - 1)
    def _():
        s = sum_acc[...]                       # [B, 8, tile_c]; all 8 rows identical
        gf = s[:, 0, :] * inv_hw               # [B, tile_c] f32
        gf_ref[...] = gf.astype(gf_ref.dtype)

        # BatchNorm1d with training-mode batch statistics (biased variance).
        # Per-channel, so it is exact on a per-C-tile basis.
        mu = jnp.mean(gf, axis=0, keepdims=True)
        var = jnp.mean((gf - mu) * (gf - mu), axis=0, keepdims=True)
        inv_std = jax.lax.rsqrt(var + BN_EPS)
        feat = (gf - mu) * inv_std * gamma_ref[...] + beta_ref[...]

        # Per-C-tile classifier partial product (contraction over C is finished by a
        # tiny sum outside the kernel, keeping this grid axis 'parallel' for megacore).
        part = jnp.dot(feat.astype(wcls_ref.dtype), wcls_ref[...],
                       preferred_element_type=jnp.float32)
        cls_ref[...] = part[None]


def _choose_tiles(B, C, HW, itemsize, x_block_budget=12 << 20):
    """Pick (tile_c, tile_hw): large blocks for HBM efficiency, bounded for v7x VMEM."""
    # Spatial tile: whole (128-padded) HW when small, 512-lane chunks otherwise.
    tile_hw = _round_up(HW, 128) if HW <= 512 else 512
    # Channel tile: target 512, shrunk so one x block stays under budget
    # (Pallas double-buffers it -> 2x in VMEM).
    max_c = (x_block_budget // max(1, B * tile_hw * itemsize)) // 128 * 128
    tile_c = max(128, min(512, max_c, _round_up(C, 128)))
    # Very large batches: shrink the spatial tile rather than go below 128 channels.
    while B * tile_c * tile_hw * itemsize > x_block_budget and tile_hw > 128:
        tile_hw = max(128, (tile_hw // 2) // 128 * 128)
    return tile_c, tile_hw


def backbone_forward(x_nchw, bn_gamma, bn_beta, cls_weight):
    """Backbone head (training path, cos_layer=False, neck='bnneck').

    x_nchw:     [B, C, H, W]       backbone feature map, native dtype (e.g. bf16)
    bn_gamma:   [C]                BatchNorm1d weight
    bn_beta:    [C]                BatchNorm1d bias
    cls_weight: [NUM_CLASSES, C]   nn.Linear weight layout (no bias)

    Returns (cls_score [B, NUM_CLASSES] f32, global_feat [B, C] f32).
    """
    B, C, H, W = x_nchw.shape
    HW = H * W
    num_classes = cls_weight.shape[0]
    ncp = _round_up(num_classes, 128)                 # lane-dense classifier output
    itemsize = jnp.dtype(x_nchw.dtype).itemsize

    tile_c, tile_hw = _choose_tiles(B, C, HW, itemsize)
    c_pad = _round_up(C, tile_c)
    hw_pad = _round_up(HW, tile_hw)
    nc, nhw = c_pad // tile_c, hw_pad // tile_hw

    # Free reshape NCHW -> [B, C, HW]; zero-pad only if C/HW are ragged
    # (zeros do not perturb the spatial sum; we divide by the true HW).
    x = x_nchw.reshape(B, C, HW)
    if (c_pad, hw_pad) != (C, HW):
        x = jnp.pad(x, ((0, 0), (0, c_pad - C), (0, hw_pad - HW)))

    gamma = bn_gamma.astype(jnp.float32).reshape(1, C)
    beta = bn_beta.astype(jnp.float32).reshape(1, C)
    if c_pad != C:
        gamma = jnp.pad(gamma, ((0, 0), (0, c_pad - C)), constant_values=1.0)
        beta = jnp.pad(beta, ((0, 0), (0, c_pad - C)))

    # Classifier weight: transpose (tiny) + cast to the activation dtype so the
    # per-C-tile weight slab streams at half width and the MXU stays on bf16.
    w_t = jnp.transpose(cls_weight).astype(x_nchw.dtype)      # [C, NUM_CLASSES]
    w_t = jnp.pad(w_t, ((0, c_pad - C), (0, ncp - num_classes)))

    # Ones operand for the MXU spatial reduction (resident, fetched once).
    ones = jnp.ones((B, 8, tile_hw), dtype=x_nchw.dtype)

    kernel = functools.partial(_head_kernel, inv_hw=1.0 / HW)

    cls_parts, gf_pad = pl.pallas_call(
        kernel,
        grid=(nc, nhw),
        in_specs=[
            pl.BlockSpec((B, 8, tile_hw), lambda ci, hwi: (0, 0, 0)),
            pl.BlockSpec((B, tile_c, tile_hw), lambda ci, hwi: (0, ci, hwi)),
            pl.BlockSpec((1, tile_c), lambda ci, hwi: (0, ci)),
            pl.BlockSpec((1, tile_c), lambda ci, hwi: (0, ci)),
            pl.BlockSpec((tile_c, ncp), lambda ci, hwi: (ci, 0)),
        ],
        out_specs=[
            pl.BlockSpec((1, B, ncp), lambda ci, hwi: (ci, 0, 0)),
            pl.BlockSpec((B, tile_c), lambda ci, hwi: (0, ci)),
        ],
        out_shape=(
            jax.ShapeDtypeStruct((nc, B, ncp), jnp.float32),
            jax.ShapeDtypeStruct((B, c_pad), jnp.float32),
        ),
        scratch_shapes=[
            pltpu.VMEM((B, 8, tile_c), jnp.float32),          # spatial-sum accumulator
        ],
        # C axis carries nothing across tiles -> 'parallel' (megacore on v7x);
        # HW axis carries the spatial-sum accumulator -> 'arbitrary'.
        compiler_params=pltpu.CompilerParams(
            dimension_semantics=("parallel", "arbitrary"),
            vmem_limit_bytes=48 << 20),
    )(ones, x, gamma, beta, w_t)

    # Finish the classifier contraction over C tiles (tiny) and drop lane padding.
    cls_score = jnp.sum(cls_parts, axis=0)[:, :num_classes]
    global_feat = gf_pad[:, :C]
    return cls_score, global_feat


def reference_forward(x_nchw, bn_gamma, bn_beta, cls_weight, matmul_dtype=None):
    """Pure-JAX reference of the same forward (training path).

    `matmul_dtype` mirrors the kernel's classifier matmul precision (bf16 in production).
    """
    xf = x_nchw.astype(jnp.float32)
    gf = jnp.mean(xf, axis=(2, 3))                        # [B, C]
    mu = jnp.mean(gf, axis=0, keepdims=True)
    var = jnp.mean((gf - mu) ** 2, axis=0, keepdims=True)
    feat = ((gf - mu) / jnp.sqrt(var + BN_EPS)
            * bn_gamma[None, :].astype(jnp.float32)
            + bn_beta[None, :].astype(jnp.float32))
    if matmul_dtype is None:
        cls = feat @ cls_weight.astype(jnp.float32).T
    else:
        cls = jnp.dot(feat.astype(matmul_dtype),
                      cls_weight.astype(matmul_dtype).T,
                      preferred_element_type=jnp.float32)
    return cls, gf


if __name__ == "__main__":
    # Small shapes consistent with the module (in_planes / num_classes scaled down
    # from 2048 / 751); picked so BOTH grid axes tile (2 x 2 grid: tile_c=512, tile_hw=512).
    B, C, H, W = 2, 1024, 32, 32
    NUM_CLASSES = 10

    key = jax.random.PRNGKey(0)
    kx, kw = jax.random.split(key)

    # Synthetic ResNet50 output feature map (stand-in for self.base(x)), bf16 so the
    # kernel streams the native dtype and accumulates in f32 on the MXU.
    x = jax.random.normal(kx, (B, C, H, W), dtype=jnp.float32).astype(jnp.bfloat16)

    # Parameter init mirroring the module's __init__:
    #   classifier: Linear(C, NUM_CLASSES, bias=False), weight ~ N(0, 0.001)
    #   bottleneck: BatchNorm1d(C), kaiming init -> weight=1, bias=0 (bias frozen)
    cls_weight = 0.001 * jax.random.normal(kw, (NUM_CLASSES, C), dtype=jnp.float32)
    bn_gamma = jnp.ones((C,), dtype=jnp.float32)
    bn_beta = jnp.zeros((C,), dtype=jnp.float32)

    cls_score, global_feat = backbone_forward(x, bn_gamma, bn_beta, cls_weight)
    jax.block_until_ready((cls_score, global_feat))

    # TODO(synk): eval path (running BN stats / neck_feat) not covered; this checks the
    # training-path outputs (cls_score, global_feat) against a precision-matched reference.
    ref_cls, ref_gf = reference_forward(x, bn_gamma, bn_beta, cls_weight,
                                        matmul_dtype=x.dtype)
    assert cls_score.shape == (B, NUM_CLASSES)
    assert global_feat.shape == (B, C)
    gf_err = float(jnp.max(jnp.abs(global_feat - ref_gf)))
    cls_err = float(jnp.max(jnp.abs(cls_score - ref_cls)))
    assert jnp.allclose(global_feat, ref_gf, atol=1e-5, rtol=1e-4), gf_err
    assert jnp.allclose(cls_score, ref_cls, atol=5e-4, rtol=5e-3), cls_err

    print("KERNEL_OK")
</pallas_src>

<mosaic_0001>
module attributes {stable_mosaic.version = 11 : i64} {
  func.func @_head_kernel(%arg0: i32, %arg1: i32, %arg2: memref<2x8x512xbf16, #tpu.memory_space<vmem>>, %arg3: memref<2x512x512xbf16, #tpu.memory_space<vmem>>, %arg4: memref<1x512xf32, #tpu.memory_space<vmem>>, %arg5: memref<1x512xf32, #tpu.memory_space<vmem>>, %arg6: memref<512x128xbf16, #tpu.memory_space<vmem>>, %arg7: memref<1x2x128xf32, #tpu.memory_space<vmem>>, %arg8: memref<2x512xf32, #tpu.memory_space<vmem>>, %arg9: memref<2x8x512xf32, #tpu.memory_space<vmem>>) attributes {dimension_semantics = [#tpu.dimension_semantics<parallel>, #tpu.dimension_semantics<arbitrary>], iteration_bounds = array<i64: 2, 2>, scalar_prefetch = 0 : i64, scratch_operands = 1 : i64, tpu.core_type = #tpu.core_type<tc>, window_params = [{pipeline_mode = #tpu.pipeline_mode<synchronous>, transform_indices = @transform_0, window_bounds = array<i64: 2, 8, 512>}, {transform_indices = @transform_1, window_bounds = array<i64: 2, 512, 512>}, {transform_indices = @transform_2, window_bounds = array<i64: 1, 512>}, {transform_indices = @transform_3, window_bounds = array<i64: 1, 512>}, {transform_indices = @transform_4, window_bounds = array<i64: 512, 128>}, {transform_indices = @transform_5, window_bounds = array<i64: 1, 2, 128>}, {transform_indices = @transform_6, window_bounds = array<i64: 2, 512>}]} {
    %c0_i32 = arith.constant 0 : i32
    %0 = arith.cmpi eq, %arg1, %c0_i32 : i32
    %1 = arith.extui %0 : i1 to i32
    %c0_i32_0 = arith.constant 0 : i32
    %2 = arith.cmpi ne, %1, %c0_i32_0 : i32
    scf.if %2 {
      %cst_13 = arith.constant 0.000000e+00 : f32
      %12 = vector.broadcast %cst_13 : f32 to vector<2x8x512xf32>
      %c0_14 = arith.constant 0 : index
      %c0_15 = arith.constant 0 : index
      %c0_16 = arith.constant 0 : index
      %13 = vector.load %arg9[%c0_14, %c0_15, %c0_16] : memref<2x8x512xf32, #tpu.memory_space<vmem>>, vector<2x8x512xf32>
      tpu.vector_store %arg9[%c0_14, %c0_15, %c0_16], %12 {strides = array<i32>} : memref<2x8x512xf32, #tpu.memory_space<vmem>>, vector<2x8x512xf32>,
    } else {
    }
    %c0 = arith.constant 0 : index
    %c0_1 = arith.constant 0 : index
    %c0_2 = arith.constant 0 : index
    %3 = vector.load %arg2[%c0, %c0_1, %c0_2] : memref<2x8x512xbf16, #tpu.memory_space<vmem>>, vector<2x8x512xbf16>
    %c0_3 = arith.constant 0 : index
    %c0_4 = arith.constant 0 : index
    %c0_5 = arith.constant 0 : index
    %4 = vector.load %arg3[%c0_3, %c0_4, %c0_5] : memref<2x512x512xbf16, #tpu.memory_space<vmem>>, vector<2x512x512xbf16>
    "tpu.trace_start"() <{level = 10 : i32, message = "bks,bcs->bkc"}> : () -> ()
    %cst = arith.constant dense<0.000000e+00> : vector<2x8x512xf32>
    %5 = tpu.matmul %3, %4, %cst {dimension_numbers = #tpu.dot_dimension_numbers<[2], [2], [1], [1], [0, 0, 0, 1, 1, 1], [0], [0]>} : vector<2x8x512xbf16>, vector<2x512x512xbf16>, vector<2x8x512xf32> -> vector<2x8x512xf32>
    "tpu.trace_stop"() : () -> ()
    %c0_6 = arith.constant 0 : index
    %c0_7 = arith.constant 0 : index
    %c0_8 = arith.constant 0 : index
    %6 = vector.load %arg9[%c0_6, %c0_7, %c0_8] : memref<2x8x512xf32, #tpu.memory_space<vmem>>, vector<2x8x512xf32>
    %7 = arith.addf %6, %5 : vector<2x8x512xf32>
    %c0_9 = arith.constant 0 : index
    %c0_10 = arith.constant 0 : index
    %c0_11 = arith.constant 0 : index
    %8 = vector.load %arg9[%c0_9, %c0_10, %c0_11] : memref<2x8x512xf32, #tpu.memory_space<vmem>>, vector<2x8x512xf32>
    tpu.vector_store %arg9[%c0_9, %c0_10, %c0_11], %7 {strides = array<i32>} : memref<2x8x512xf32, #tpu.memory_space<vmem>>, vector<2x8x512xf32>,
    %c1_i32 = arith.constant 1 : i32
    %9 = arith.cmpi eq, %arg1, %c1_i32 : i32
    %10 = arith.extui %9 : i1 to i32
    %c0_i32_12 = arith.constant 0 : i32
    %11 = arith.cmpi ne, %10, %c0_i32_12 : i32
    scf.if %11 {
      %c0_13 = arith.constant 0 : index
      %c0_14 = arith.constant 0 : index
      %c0_15 = arith.constant 0 : index
      %12 = vector.load %arg9[%c0_13, %c0_14, %c0_15] : memref<2x8x512xf32, #tpu.memory_space<vmem>>, vector<2x8x512xf32>
      %13 = vector.extract_strided_slice %12 {offsets = [0, 0, 0], sizes = [2, 1, 512], strides = [1, 1, 1]} : vector<2x8x512xf32> to vector<2x1x512xf32>
      %14 = vector.shape_cast %13 : vector<2x1x512xf32> to vector<2x512xf32>
      %cst_16 = arith.constant 9.765625E-4 : f32
      %15 = vector.broadcast %cst_16 : f32 to vector<2x512xf32>
      %16 = arith.mulf %14, %15 : vector<2x512xf32>
      %c0_17 = arith.constant 0 : index
      %c0_18 = arith.constant 0 : index
      %17 = vector.load %arg8[%c0_17, %c0_18] : memref<2x512xf32, #tpu.memory_space<vmem>>, vector<2x512xf32>
      tpu.vector_store %arg8[%c0_17, %c0_18], %16 {strides = array<i32>} : memref<2x512xf32, #tpu.memory_space<vmem>>, vector<2x512xf32>,
      %cst_19 = arith.constant dense<0.000000e+00> : vector<512xf32>
      %18 = vector.multi_reduction <add>, %16, %cst_19 [0] : vector<2x512xf32> to vector<512xf32>
      %19 = vector.shape_cast %18 : vector<512xf32> to vector<1x512xf32>
      %cst_20 = arith.constant 2.000000e+00 : f32
      %20 = vector.broadcast %cst_20 : f32 to vector<1x512xf32>
      %21 = arith.divf %19, %20 : vector<1x512xf32>
      %22 = vector.broadcast %21 : vector<1x512xf32> to vector<2x512xf32>
      %23 = arith.subf %16, %22 : vector<2x512xf32>
      %24 = vector.broadcast %21 : vector<1x512xf32> to vector<2x512xf32>
      %25 = arith.subf %16, %24 : vector<2x512xf32>
      %26 = arith.mulf %23, %25 : vector<2x512xf32>
      %cst_21 = arith.constant dense<0.000000e+00> : vector<512xf32>
      %27 = vector.multi_reduction <add>, %26, %cst_21 [0] : vector<2x512xf32> to vector<512xf32>
      %28 = vector.shape_cast %27 : vector<512xf32> to vector<1x512xf32>
      %cst_22 = arith.constant 2.000000e+00 : f32
      %29 = vector.broadcast %cst_22 : f32 to vector<1x512xf32>
      %30 = arith.divf %28, %29 : vector<1x512xf32>
      %cst_23 = arith.constant 9.99999974E-6 : f32
      %31 = vector.broadcast %cst_23 : f32 to vector<1x512xf32>
      %32 = arith.addf %30, %31 : vector<1x512xf32>
      %33 = math.rsqrt %32 : vector<1x512xf32>
      %34 = vector.broadcast %21 : vector<1x512xf32> to vector<2x512xf32>
      %35 = arith.subf %16, %34 : vector<2x512xf32>
      %36 = vector.broadcast %33 : vector<1x512xf32> to vector<2x512xf32>
      %37 = arith.mulf %35, %36 : vector<2x512xf32>
      %c0_24 = arith.constant 0 : index
      %c0_25 = arith.constant 0 : index
      %38 = vector.load %arg4[%c0_24, %c0_25] : memref<1x512xf32, #tpu.memory_space<vmem>>, vector<1x512xf32>
      %39 = vector.broadcast %38 : vector<1x512xf32> to vector<2x512xf32>
      %40 = arith.mulf %37, %39 : vector<2x512xf32>
      %c0_26 = arith.constant 0 : index
      %c0_27 = arith.constant 0 : index
      %41 = vector.load %arg5[%c0_26, %c0_27] : memref<1x512xf32, #tpu.memory_space<vmem>>, vector<1x512xf32>
      %42 = vector.broadcast %41 : vector<1x512xf32> to vector<2x512xf32>
      %43 = arith.addf %40, %42 : vector<2x512xf32>
      %44 = arith.truncf %43 : vector<2x512xf32> to vector<2x512xbf16>
      %c0_28 = arith.constant 0 : index
      %c0_29 = arith.constant 0 : index
      %45 = vector.load %arg6[%c0_28, %c0_29] : memref<512x128xbf16, #tpu.memory_space<vmem>>, vector<512x128xbf16>
      %cst_30 = arith.constant dense<0.000000e+00> : vector<2x128xf32>
      %46 = tpu.matmul %44, %45, %cst_30 {dimension_numbers = #tpu.dot_dimension_numbers<[1], [0], [0], [1], [0, 0, 1, 1], [], []>} : vector<2x512xbf16>, vector<512x128xbf16>, vector<2x128xf32> -> vector<2x128xf32>
      %47 = vector.shape_cast %46 : vector<2x128xf32> to vector<1x2x128xf32>
      %c0_31 = arith.constant 0 : index
      %c0_32 = arith.constant 0 : index
      %c0_33 = arith.constant 0 : index
      %48 = vector.load %arg7[%c0_31, %c0_32, %c0_33] : memref<1x2x128xf32, #tpu.memory_space<vmem>>, vector<1x2x128xf32>
      tpu.vector_store %arg7[%c0_31, %c0_32, %c0_33], %47 {strides = array<i32>} : memref<1x2x128xf32, #tpu.memory_space<vmem>>, vector<1x2x128xf32>,
    } else {
    }
    return
  }
  func.func @transform_0(%arg0: i32, %arg1: i32) -> (i32, i32, i32) {
    %c0_i32 = arith.constant 0 : i32
    %c0_i32_0 = arith.constant 0 : i32
    %c0_i32_1 = arith.constant 0 : i32
    %c0_i32_2 = arith.constant 0 : i32
    return %c0_i32, %c0_i32_0, %c0_i32_1 : i32, i32, i32
  }
  func.func @transform_1(%arg0: i32, %arg1: i32) -> (i32, i32, i32) {
    %c0_i32 = arith.constant 0 : i32
    %c0_i32_0 = arith.constant 0 : i32
    return %c0_i32, %arg0, %arg1 : i32, i32, i32
  }
  func.func @transform_2(%arg0: i32, %arg1: i32) -> (i32, i32) {
    %c0_i32 = arith.constant 0 : i32
    %c0_i32_0 = arith.constant 0 : i32
    return %c0_i32, %arg0 : i32, i32
  }
  func.func @transform_3(%arg0: i32, %arg1: i32) -> (i32, i32) {
    %c0_i32 = arith.constant 0 : i32
    %c0_i32_0 = arith.constant 0 : i32
    return %c0_i32, %arg0 : i32, i32
  }
  func.func @transform_4(%arg0: i32, %arg1: i32) -> (i32, i32) {
    %c0_i32 = arith.constant 0 : i32
    %c0_i32_0 = arith.constant 0 : i32
    return %arg0, %c0_i32 : i32, i32
  }
  func.func @transform_5(%arg0: i32, %arg1: i32) -> (i32, i32, i32) {
    %c0_i32 = arith.constant 0 : i32
    %c0_i32_0 = arith.constant 0 : i32
    %c0_i32_1 = arith.constant 0 : i32
    return %arg0, %c0_i32, %c0_i32_0 : i32, i32, i32
  }
  func.func @transform_6(%arg0: i32, %arg1: i32) -> (i32, i32) {
    %c0_i32 = arith.constant 0 : i32
    %c0_i32_0 = arith.constant 0 : i32
    return %c0_i32, %arg0 : i32, i32
  }
}

</mosaic_0001>

<bundles_post_ra>
// kernel: tpu_custom_call.1
= control target key start
LH: loop header
LB: loop body
LE: loop exit
PB: predicated region body
PF: predicated region fallthrough
CT: control target
= control target key end

     0   :  { %s5357_s0 = inlined_call_operand.hbm [shape: bf16[2,8,512], index: 0, kind: input, shape index: {}]   ;;  %s5358_s1 = inlined_call_operand.hbm [shape: bf16[2,1024,1024], index: 1, kind: input, shape index: {}]   ;;  %s5359_s2 = inlined_call_operand.hbm [shape: f32[1,1024], index: 2, kind: input, shape index: {}]   ;;  %s5360_s3 = inlined_call_operand.hbm [shape: f32[1,1024], index: 3, kind: input, shape index: {}]   ;;  %s5361_s4 = inlined_call_operand.hbm [shape: bf16[1024,128], index: 4, kind: input, shape index: {}]   ;;  %s5362_s5 = inlined_call_operand.hbm [shape: f32[2,2,128], index: 5, kind: output, shape index: {0}]   ;;  %s5363_s6 = inlined_call_operand.hbm [shape: f32[2,1024], index: 6, kind: output, shape index: {1}]  }
   0x1   :  { %5381 = sst [smem:[#allocation35_spill]] %s5357_s0 }
   0x2   :  { %5382 = sst [smem:[#allocation36_spill]] %s5358_s1 }
   0x3   :  { %5383 = sst [smem:[#allocation37_spill]] %s5360_s3 }
   0x4   :  { %5384 = sst [smem:[#allocation38_spill]] %s5362_s5 }
   0x5   :  { %5385 = sst [smem:[#allocation39_spill]] %s5363_s6 }
   0x6   :  { %12 = vsyncpa [#allocation4], 0 }
   0x7   :  { %13 = vsyncpa [#allocation7], 0 }
   0x8   :  { %15 = vsyncpa [#allocation7 + $0x1], 0 }
   0x9   :  { %16 = vsyncpa [#allocation10], 0 }
   0xa   :  { %18 = vsyncpa [#allocation10 + $0x1], 0 }
   0xb   :  { %19 = vsyncpa [#allocation5], 0 }
   0xc   :  { %21 = vsyncpa [#allocation5 + $0x1], 0 }
   0xd   :  { %22 = vsyncpa [#allocation14], 0 }
   0xe   :  { %24 = vsyncpa [#allocation14 + $0x1], 0  ;;  %s4563_s21 = smov 0   ;;  %s4565_s22 = smov 0  }
   0xf   :  { %s4567_s23 = smov 0   ;;  %s4569_s24 = smov 0  }
  0x10   :  { %s4571_s25 = smov 0   ;;  %s4573_s26 = smov 0  }
  0x11   :  { %s4575_s27 = smov 0   ;;  %s4577_s28 = smov 0  }
  0x12   :  { %s4579_s29 = smov 0   ;;  %s4581_s30 = smov 0  }
  0x13   :  { %s4583_s7 = smov 0  }
  0x14 LB: > { %5386 = sst [smem:[#allocation24_spill]] %s4467_s21  ;;  %s4617_s8 = sadd.s32 4294967295, %s4507_s7   ;;  %s4507_s7 = sphi %s4583_s7, %s30_s7   ;;  %s4503_s30 = sphi %s4581_s30, %s5434_s30   ;;  %s4499_s29 = sphi %s4579_s29, %s5427_s29   ;;  %s4495_s28 = sphi %s4577_s28, %s5433_s28   ;;  %s4491_s27 = sphi %s4575_s27, %s5426_s27   ;;  %s4487_s26 = sphi %s4573_s26, %s5425_s26   ;;  %s4483_s25 = sphi %s4571_s25, %s5432_s25   ;;  %s4479_s24 = sphi %s4569_s24, %s5431_s24   ;;  %s4475_s23 = sphi %s4567_s23, %s5423_s23   ;;  %s4471_s22 = sphi %s4565_s22, %s5430_s22   ;;  %s4467_s21 = sphi %s4563_s21, %s5429_s21  }
  0x15   : > { %5387 = sst [smem:[#allocation25_spill]] %s4475_s23  ;;  %s3288_s9 = sadd.s32 4294967294, %s4507_s7  }
  0x16   : > { %5388 = sst [smem:[#allocation26_spill]] %s4487_s26  ;;  %s39_s10 = sadd.s32 1, %s4499_s29 }
  0x17   : > { %5389 = sst [smem:[#allocation27_spill]] %s4495_s28  ;;  %s42_s11 = sadd.s32 1, %s4503_s30 }
  0x18   : > { %5390 = sst [smem:[#allocation28_spill]] %s4499_s29  ;;  %p40_p0 = scmp.ge.s32.totalorder %s39_s10, 2 }
  0x19   : > { %s72_s12 = sadd.s32 1, %s4487_s26  ;;  %p79_p1 = scmp.ne.s32.totalorder %s4487_s26, %s4483_s25 }
  0x1a   : > { %p80_p2 = scmp.eq.s32.totalorder %s4507_s7, 0  ;;  %s5436_s10 = smov (%p40_p0, %s39_s10), 0 }
  0x1b   : > { %5391 = sst [smem:[#allocation29_spill]] %s5436_s10  ;;  %s5438_s11 = smov (!%p40_p0, %s42_s11), %s4503_s30 }
  0x1c   : > { %s68_s13 = ssub.s32 %s4499_s29, %s5436_s10  ;;  %p4633_p3 = por %p80_p2, %p79_p1 }
  0x1d   : > { %p44_p4 = scmp.ge.s32.totalorder %s5438_s11, 2  ;;  %p85_p5 = scmp.ne.s32.totalorder %s4483_s25, %s4479_s24 }
  0x1e   : > { %p5365_p6 = scmp.eq.s32.totalorder %s4617_s8, 0  ;;  %s98_s15 = sadd.s32 1, %s4475_s23 }
  0x1f   : > { %s5440_s11 = smov (%p44_p4, %s5438_s11), 0  ;;  %p105_p8 = scmp.ne.s32.totalorder %s4475_s23, %s4471_s22 }
  0x20   : > { %5393 = sst [smem:[#allocation30_spill]] %s5440_s11  ;;  %p4644_p7 = por %p5365_p6, %p85_p5 }
  0x21   : > { %s67_s17 = ssub.s32 %s4503_s30, %s5440_s11  ;;  %p111_p9 = scmp.ne.s32.totalorder %s4471_s22, %s4467_s21 }
  0x22   : > { %s5394_s16 = scalar_select %p4644_p7, 1, 0 }
  0x23   : > { %s69_s18 = sor.u32 %s68_s13, %s67_s17  ;;  %p96_p10 = scmp.eq.s32.totalorder %s67_s17, 0 }
  0x24   : > { %p70_p11 = scmp.eq.s32.totalorder %s69_s18, 0  ;;  %p4659_p12 = por %p105_p8, %p80_p2 }
  0x25   : > { %s4664_s20 = scalar_select %p96_p10, %s4475_s23, %s98_s15  }
  0x26   : > { %s5395_s19 = scalar_select %p4659_p12, 1, 0 }
  0x27   : > { %5396 = sst [smem:[#allocation31_spill]] %s4664_s20  ;;  %p4674_p13 = por %p111_p9, %p5365_p6 }
  0x28   : > { %s4667_s24 = scalar_select %p70_p11, %s4487_s26, %s72_s12  }
  0x29   : > { %s5398_s10 = scalar_select %p4674_p13, 1, 0 }
  0x2a   : > { %5397 = sst [smem:[#allocation32_spill]] %s4667_s24  ;;  %p187_p0 = scmp.eq.s32.totalorder %s4617_s8, 3 }
  0x2b   : > { %p193_p1 = scmp.eq.s32.totalorder %s3288_s9, 3  ;;  %p3289_p4 = scmp.ge.s32.totalorder %s4507_s7, 1 }
  0x2c   : > { %p4683_p5 = por %p187_p0, %p105_p8  ;;  %p226_p2 = scmp.lt.s32.totalorder %s4507_s7, 5 }
  0x2d   : > { %p4691_p10 = por %p193_p1, %p111_p9  ;;  %s4509_s17 = smov [#allocation3]  }
  0x2e   : > { %s5399_s13 = scalar_select %p4683_p5, 1, 0 }
  0x2f   : > { %s5401_s15 = scalar_select %p4691_p10, 1, 0 }
  0x30   : > { %5400 = sst [smem:[#allocation33_spill]] %s5399_s13  ;;  %p4695_p11 = pnand %p3289_p4, %p226_p2 }
  0x31   : > { %5402 = sst [smem:[#allocation34_spill]] %s5401_s15  ;;  %s238_s18 = sshll.u32 %s4509_s17, 4  ;;  %s239_s18 = int_to_ptr.vmem [resolvable:$true] %s238_s18 }
  0x32   : > { %p3693_p6 = pneg %p4695_p11  ;;  %p5404_p8 = scmp.eq.s32.totalorder %s4617_s8, 0 }
  0x33   : > { %s4252_s9 = scalar_lea.vmem %s239_s18, 512  ;;  %p4260_p1 = scmp.lt.s32.totalorder %s239_s18, %s239_s18 }
  0x34   : > { %p3694_p0 = pnand %p3693_p6, %p5404_p8  ;;  %p4253_p5 = scmp.ne.s32.totalorder %s239_s18, %s4252_s9 }
  0x35   : > { %p4261_p12 = scmp.lt.s32.totalorder %s4252_s9, %s4252_s9 }
  0x36   : > { %p4243_p13 = pneg %p3694_p0 }
  0x37   : > { %p4262_p10 = por %p4261_p12, %p4260_p1 }
  0x38   : > { %p4255_p7 = pnand %p4253_p5, %p4243_p13 }
  0x3a   : > { %p4256_p9 = pneg %p4255_p7 }
  0x3c   : > { %p4263_p4 = pnand %p4262_p10, %p4256_p9 }
  0x3e   : > { %4266 = shalt.err (!%p4263_p4)
}
  0x3f   : > { %s4510_s11 = smov 256   ;;  %s4511_s24 = smov 16  }
  0x40   : > { %s5405_s0 = sld [smem:[#allocation35_spill]]  ;;  %p3291_p2 = scmp.ge.s32.totalorder %s4507_s7, 4 }
  0x42   : > { %248 = sbr.rel (%p3291_p2) target bundleno = 131 (0x83), region = 20 }
  0x46   : > { %3696 = dma.hbm_to_vmem [thread:$0]  (!%p3694_p0), %s5405_s0, 512, %s239_s18, [#allocation4], %s4510_s11, %s4510_s11, %s4511_s24  }
  0x47   : > { %s254_s17 = sand.u32 1, %s4487_s26   ;;  %s3294_s6 = sshll.u32 %s4499_s29, 2 }
  0x48   : > { %s3292_s21 = sshll.u32 %s254_s17, 11  ;;  %s3621_s5 = sshll.u32 %s4503_s30, 9 }
  0x49   : > { %s263_s13 = sadd.s32 %s3621_s5, %s3294_s6  ;;  %s256_s20 = scalar_lea.vmem [#allocation6], %s3292_s21 }
  0x4a   : > { %s278_s11 = sshll.u32 %s256_s20, 4  ;;  %s3296_s24 = sshll.u32 %s263_s13, 6  ;;  %s279_s11 = int_to_ptr.vmem [resolvable:$true] %s278_s11 }
  0x4b   : > { %s4512_s15 = smov 65536   ;;  %s4513_s26 = smov 16384  }
  0x4c   : > { %3673 = sst [smem:[#allocation16]] (%p4633_p3), %s4512_s15  ;;  %s4514_s17 = smov 64  }
  0x4d   : > { %s3672_s18 = scalar_select %p4633_p3, [#allocation0], [#allocation17] }
  0x4e   : > { %3674 = sst [smem:[#allocation16 + $0x1]] (%p4633_p3), %s4513_s26  ;;  %s4515_s5 = smov 512  }
  0x4f   : > { %s270_s0 = sld [smem:[%s3672_s18]]   ;;  %s4516_s20 = smov 256  }
  0x50   : > { %3675 = sst [smem:[#allocation16 + $0x2]] (%p4633_p3), %s4514_s17  ;;  %s4517_s15 = smov 16  }
  0x51   : > { %3676 = sst [smem:[#allocation16 + $0x3]] (%p4633_p3), %s4515_s5  ;;  %s5407_s26 = sand.u32 1, %s4507_s7  }
  0x52   : > { %s5406_s1 = sld [smem:[#allocation36_spill]]  ;;  %s4730_s29 = scalar_lea.sflag [#allocation7], %s5407_s26 }
  0x53   : > { %3677 = sst [smem:[#allocation16 + $0x4]] (%p4633_p3), %s4516_s20  ;;  %s4518_s17 = smov 131072  }
  0x54   : > { %3678 = sst [smem:[#allocation16 + $0x5]] (%p4633_p3), %s4517_s15  ;;  %s3622_s5 = sshll.u32 %s4503_s30, 6 }
  0x55   : > { %s3297_s18 = sshll.u32 %s270_s0, 26  ;;  %s4742_s28 = scalar_lea.sflag [#allocation10], %s5407_s26 }
  0x56   : > { %s3298_s9 = sadd.s32 134217728, %s3297_s18  ;;  %p5409_p6 = scmp.ne.s32.totalorder %s5395_s19, 0 }
  0x58   : > { %s265_s13 = scalar_lea.hbm %s5406_s1, %s3296_s24  ;;  %s303_s24 = sand.u32 1, %s4475_s23  }
  0x59   : > { %3679 = dma.general (%p4633_p3), %s265_s13, 32768, %s279_s11, %s4730_s29, %s4518_s17, [#allocation16], %s3298_s9, 0  }
  0x5a   : > { %s3299_s6 = sshll.u32 %s303_s24, 2  ;;  %s5408_s3 = sld [smem:[#allocation37_spill]] }
  0x5b   : > { %s324_s0 = scalar_lea.vmem [#allocation9], %s3299_s6  ;;  %s3305_s1 = sshll.u32 %s303_s24, 8 }
  0x5c   : > { %s332_s18 = sshll.u32 %s324_s0, 4  ;;  %s4519_s9 = smov [#allocation9]   ;;  %s333_s18 = int_to_ptr.vmem [resolvable:$true] %s332_s18 }
  0x5d   : > { %s4279_s14 = scalar_lea.vmem %s333_s18, 64  ;;  %s4283_s11 = sshll.u32 %s4519_s9, 4  ;;  %s4284_s11 = int_to_ptr.vmem [resolvable:$false] %s4283_s11 }
  0x5e   : > { %p4280_p3 = scmp.ne.s32.totalorder %s333_s18, %s4279_s14  ;;  %s4285_s13 = scalar_lea.vmem %s4284_s11, 128 }
  0x5f   : > { %p4286_p13 = scmp.lt.s32.totalorder %s333_s18, %s4284_s11  ;;  %p4287_p5 = scmp.lt.s32.totalorder %s4285_s13, %s4279_s14 }
  0x60   : > { %s330_s15 = scalar_lea.hbm %s5408_s3, %s3622_s5  ;;  %p4281_p7 = pnand %p4280_p3, %p5409_p6 }
  0x61   : > { %p4288_p10 = por %p4287_p5, %p4286_p13 }
  0x62   : > { %p4282_p12 = pneg %p4281_p7 }
  0x64   : > { %p4289_p8 = pnand %p4288_p10, %p4282_p12 }
  0x66   : > { %4292 = shalt.err (!%p4289_p8)
}
  0x67   : > { %3681 = dma.hbm_to_vmem [thread:$0]  (%p5409_p6), %s330_s15, 64, %s333_s18, %s4742_s28  }
  0x68   : > { %s343_s17 = scalar_lea.vmem [#allocation11], %s3305_s1  ;;  %s311_s0 = scalar_lea.hbm %s5359_s2, %s3622_s5 }
  0x69   : > { %s350_s24 = sshll.u32 %s343_s17, 4  ;;  %s305_s26 = scalar_lea.vmem [#allocation8], %s3299_s6  ;;  %s4749_s24 = int_to_ptr.vmem [resolvable:$true] %s350_s24 }
  0x6a   : > { %s313_s9 = sshll.u32 %s305_s26, 4  ;;  %s3624_s14 = sshll.u32 %s4503_s30, 12  ;;  %s314_s9 = int_to_ptr.vmem [resolvable:$true] %s313_s9 }
  0x6b   : > { %s4758_s3 = scalar_lea.hbm %s5361_s4, %s3624_s14  ;;  %s4305_s23 = scalar_lea.vmem %s314_s9, 64 }
  0x6c   : > { %p4306_p0 = scmp.ne.s32.totalorder %s314_s9, %s4305_s23  ;;  %s4520_s1 = smov [#allocation8]  }
  0x6d   : > { %s4309_s15 = sshll.u32 %s4520_s1, 4  ;;  %s4310_s15 = int_to_ptr.vmem [resolvable:$false] %s4309_s15 }
  0x6e   : > { %p4307_p9 = pnand %p4306_p0, %p5409_p6  ;;  %s4311_s18 = scalar_lea.vmem %s4310_s15, 128 }
  0x6f   : > { %p4312_p4 = scmp.lt.s32.totalorder %s314_s9, %s4310_s15  ;;  %p4313_p2 = scmp.lt.s32.totalorder %s4311_s18, %s4305_s23 }
  0x70   : > { %p4308_p1 = pneg %p4307_p9 }
  0x71   : > { %p4314_p3 = por %p4313_p2, %p4312_p4 }
  0x73   : > { %p4315_p7 = pnand %p4314_p3, %p4308_p1 }
  0x75   : > { %4318 = shalt.err (!%p4315_p7)
}
  0x76   : > { %3680 = dma.hbm_to_vmem [thread:$0]  (%p5409_p6), %s311_s0, 64, %s314_s9, %s4730_s29  }
  0x77   : > { %s4331_s5 = scalar_lea.vmem %s4749_s24, 4096  ;;  %s4521_s6 = smov [#allocation11]  }
  0x78   : > { %p4332_p12 = scmp.ne.s32.totalorder %s4749_s24, %s4331_s5  ;;  %s4335_s17 = sshll.u32 %s4521_s6, 4  ;;  %s4336_s17 = int_to_ptr.vmem [resolvable:$false] %s4335_s17 }
  0x79   : > { %s4337_s23 = scalar_lea.vmem %s4336_s17, 8192  ;;  %p4338_p10 = scmp.lt.s32.totalorder %s4749_s24, %s4336_s17 }
  0x7a   : > { %p4333_p13 = pnand %p4332_p12, %p5409_p6  ;;  %p4339_p8 = scmp.lt.s32.totalorder %s4337_s23, %s4331_s5 }
  0x7c   : > { %p4334_p5 = pneg %p4333_p13  ;;  %p4340_p0 = por %p4339_p8, %p4338_p10 }
  0x7e   : > { %p4341_p9 = pnand %p4340_p0, %p4334_p5 }
  0x80   : > { %4344 = shalt.err (!%p4341_p9)
}
  0x81   : > { %s4522_s21 = smov 64   ;;  %s4523_s29 = smov 4  }
  0x82   : > { %3682 = dma.hbm_to_vmem [thread:$0]  (%p5409_p6), %s4758_s3, 4096, %s4749_s24, %s4742_s28, %s4522_s21, %s4522_s21, %s4523_s29  }
  0x83 PF: > { %362 = sbr.rel (%p4695_p11) target bundleno = 1226 (0x4ca), region = 40  ;;  %p5410_p1 = scmp.eq.s32.totalorder (!%p4695_p11), %s4617_s8, 0 }
  0x88   : > { %4442 = dma.done.wait (%p5410_p1), [#allocation4], 512   ;;  %p5411_p4 = pmov %p5410_p1 }
  0x89   : > { %s368_s20 = sand.u32 1, %s4617_s8   ;;  %s370_s0 = sand.u32 1, %s4483_s25  }
  0x8a   : > { %4444 = vsyncadd (%p5411_p4), [#allocation4], 4294966784  ;;  %s3310_s26 = sshll.u32 %s370_s0, 11  ;;  %s369_s9 = scalar_lea.sflag [#allocation7], %s368_s20 }
  0x8b   : > { %s4783_s14 = scalar_lea.vmem [#allocation6], %s3310_s26  ;;  %p5412_p6 = scmp.ne.s32.totalorder %s5394_s16, 0 }
  0x8d   : > { %4446 = dma.done.wait (%p5412_p6), %s369_s9, 32768  }
  0x8e   : > { %4448 = vsyncadd (%p5412_p6), %s369_s9, 4294934528  ;;  %s4790_s3 = sand.u32 1, %s4471_s22   ;;  %p5413_p11 = scmp.ne.s32.totalorder %s5398_s10, 0 }
  0x8f   : > { %s3311_s28 = sshll.u32 %s4790_s3, 2 }
  0x90   : > { %s4793_s19 = scalar_lea.vmem [#allocation8], %s3311_s28 }
  0x91   : > { %4450 = dma.done.wait (%p5413_p11), %s369_s9, 64  }
  0x92   : > { %4452 = vsyncadd (%p5413_p11), %s369_s9, 4294967232  ;;  %s387_s8 = scalar_lea.sflag [#allocation10], %s368_s20  ;;  %s4799_s12 = scalar_lea.vmem [#allocation9], %s3311_s28 }
  0x93   : > { %4454 = dma.done.wait (%p5413_p11), %s387_s8, 4160  }
  0x94   : > { %4456 = vsyncadd (%p5413_p11), %s387_s8, 4294963136  ;;  %s3313_s16 = sshll.u32 %s4790_s3, 8  ;;  %s3314_s24 = sshll.u32 %s4790_s3, 1 }
  0x95   : > { %s3315_s11 = sshll.u32 %s4790_s3, 3  ;;  %s4808_s13 = scalar_lea.vmem [#allocation11], %s3313_s16 }
  0x96   : > { %s4810_s1 = scalar_lea.vmem [#allocation12], %s3314_s24  ;;  %s4812_s15 = scalar_lea.vmem [#allocation13], %s3315_s11 }
  0x97   : > { %p3316_p2 = scmp.ne.s32.totalorder %s4491_s27, 0 }
  0x99   : > { %458 = sbr.rel (%p3316_p2) target bundleno = 163 (0xa3), region = 64 }
  0x9e   : > { %v4524_v0 = vmov 0.0  }
  0x9f   : > { %459 = vst [vmem:[#allocation2 + $0x30] sm:$0xff] %v4524_v0  ;;  %460 = vst [vmem:[#allocation2] sm:$0xff] %v4524_v0 }
  0xa0   : > { %461 = vst [vmem:[#allocation2 + $0x18] sm:$0xff] %v4524_v0  ;;  %462 = vst [vmem:[#allocation2 + $0x10] sm:$0xff] %v4524_v0 }
  0xa1   : > { %463 = vst [vmem:[#allocation2 + $0x8] sm:$0xff] %v4524_v0  ;;  %464 = vst [vmem:[#allocation2 + $0x20] sm:$0xff] %v4524_v0 }
  0xa2   : > { %465 = vst [vmem:[#allocation2 + $0x28] sm:$0xff] %v4524_v0  ;;  %466 = vst [vmem:[#allocation2 + $0x38] sm:$0xff] %v4524_v0 }
  0xa3 PF: > { %v3809_v1 = vld [vmem:[%s4783_s14 + $0xe4] ss:$16 sps:$4 sm:$0xff]   ;;  %v3811_v2 = vld [vmem:[%s4783_s14 + $0xec] ss:$16 sps:$4 sm:$0xff]   ;;  %v3813_v3 = vld [vmem:[%s4783_s14 + $0xe0] ss:$16 sps:$4 sm:$0xff]  }
  0xa4   : > { %1381 = vmatprep.subr.bf16.mxu0 %v3809_v1  ;;  %v3814_v4 = vld [vmem:[%s4783_s14 + $0xe8] ss:$16 sps:$4 sm:$0xff]   ;;  %1422 = vmatprep.subr.bf16.mxu1 %v3811_v2  ;;  %v3815_v5 = vld [vmem:[%s4783_s14 + $0xc4] ss:$16 sps:$4 sm:$0xff]   ;;  %v3817_v6 = vld [vmem:[%s4783_s14 + $0xcc] ss:$16 sps:$4 sm:$0xff]  }
  0xa5   : > { %1382 = vmatpush1.bf16.xpose.msra.mxu0 %v3813_v3  ;;  %1423 = vmatpush1.bf16.xpose.msra.mxu1 %v3814_v4  ;;  %v3819_v7 = vld [vmem:[%s4783_s14 + $0xc0] ss:$16 sps:$4 sm:$0xff]   ;;  %v3820_v8 = vld [vmem:[%s4783_s14 + $0xc8] ss:$16 sps:$4 sm:$0xff]   ;;  %v3821_v9 = vld [vmem:[%s4783_s14 + $0xa4] ss:$16 sps:$4 sm:$0xff]  }
  0xa6   : > { %1383 = vmatprep.subr.bf16.mxu0 %v3815_v5  ;;  %1424 = vmatprep.subr.bf16.mxu1 %v3817_v6  ;;  %v3823_v10 = vld [vmem:[%s4783_s14 + $0xac] ss:$16 sps:$4 sm:$0xff]   ;;  %v3825_v11 = vld [vmem:[%s4783_s14 + $0xa0] ss:$16 sps:$4 sm:$0xff]   ;;  %v3826_v12 = vld [vmem:[%s4783_s14 + $0xa8] ss:$16 sps:$4 sm:$0xff]  }
  0xa7   : > { %v3827_v13 = vld [vmem:[%s4783_s14 + $0x84] ss:$16 sps:$4 sm:$0xff]   ;;  %v3829_v14 = vld [vmem:[%s4783_s14 + $0x8c] ss:$16 sps:$4 sm:$0xff]   ;;  %v3831_v15 = vld [vmem:[%s4783_s14 + $0x80] ss:$16 sps:$4 sm:$0xff]  }
  0xa8   : > { %v3832_v16 = vld [vmem:[%s4783_s14 + $0x88] ss:$16 sps:$4 sm:$0xff]   ;;  %v3833_v17 = vld [vmem:[%s4783_s14 + $0x64] ss:$16 sps:$4 sm:$0xff]   ;;  %v3835_v18 = vld [vmem:[%s4783_s14 + $0x6c] ss:$16 sps:$4 sm:$0xff]  }
  0xa9   : > { %v3837_v19 = vld [vmem:[%s4783_s14 + $0x60] ss:$16 sps:$4 sm:$0xff]   ;;  %v3838_v20 = vld [vmem:[%s4783_s14 + $0x68] ss:$16 sps:$4 sm:$0xff]   ;;  %v3839_v21 = vld [vmem:[%s4783_s14 + $0x44] ss:$16 sps:$4 sm:$0xff]  }
  0xaa   : > { %v3841_v22 = vld [vmem:[%s4783_s14 + $0x4c] ss:$16 sps:$4 sm:$0xff]   ;;  %v3843_v23 = vld [vmem:[%s4783_s14 + $0x40] ss:$16 sps:$4 sm:$0xff]   ;;  %v3844_v24 = vld [vmem:[%s4783_s14 + $0x48] ss:$16 sps:$4 sm:$0xff]  }
  0xab   : > { %v3845_v25 = vld [vmem:[%s4783_s14 + $0x24] ss:$16 sps:$4 sm:$0xff]   ;;  %v3847_v26 = vld [vmem:[%s4783_s14 + $0x2c] ss:$16 sps:$4 sm:$0xff]   ;;  %v3849_v31 = vld [vmem:[%s4783_s14 + $0x20] ss:$16 sps:$4 sm:$0xff]  }
  0xac   : > { %v4841_v27 = vld [vmem:[#allocation3] sm:$0xff]  ;;  %v4847_v29 = vld [vmem:[#allocation3 + $0x8] sm:$0xff]  ;;  %p3581_p3 = scmp.ne.s32.totalorder %s4491_s27, 1 }
  0xad   : > { %1384 = vmatpush1.bf16.xpose.msra.mxu0 %v3819_v7  ;;  %1425 = vmatpush1.bf16.xpose.msra.mxu1 %v3820_v8  ;;  %v4845_v28 = vcombine.high %v4841_v27, %v4841_v27  ;;  %v4851_v30 = vcombine.high %v4847_v29, %v4847_v29  ;;  %v3850_v32 = vld [vmem:[%s4783_s14 + $0x28] ss:$16 sps:$4 sm:$0xff]   ;;  %v3851_v33 = vld [vmem:[%s4783_s14 + $0x4] ss:$16 sps:$4 sm:$0xff]   ;;  %v3853_v34 = vld [vmem:[%s4783_s14 + $0xc] ss:$16 sps:$4 sm:$0xff]   ;;  %v4898_v8 = vcombine.low %v4841_v27, %v4841_v27 }
  0xae   : > { %1385 = vmatprep.subr.bf16.mxu0 %v3821_v9  ;;  %1426 = vmatprep.subr.bf16.mxu1 %v3823_v10  ;;  %v3855_v35 = vld [vmem:[%s4783_s14] ss:$16 sps:$4 sm:$0xff]   ;;  %v3856_v36 = vld [vmem:[%s4783_s14 + $0x8] ss:$16 sps:$4 sm:$0xff]   ;;  %v3857_v37 = vld [vmem:[%s4783_s14 + $0x1e4] ss:$16 sps:$4 sm:$0xff]   ;;  %v4902_v9 = vcombine.low %v4847_v29, %v4847_v29 }
  0xaf   : > { %1413 = vmatprep.mubr.bf16.mxu0 %v4845_v28  ;;  %1454 = vmatprep.mubr.bf16.mxu1 %v4851_v30  ;;  %v3859_v38 = vld [vmem:[%s4783_s14 + $0x1ec] ss:$16 sps:$4 sm:$0xff]   ;;  %v3861_v39 = vld [vmem:[%s4783_s14 + $0x1e0] ss:$16 sps:$4 sm:$0xff]   ;;  %v3862_v40 = vld [vmem:[%s4783_s14 + $0x1e8] ss:$16 sps:$4 sm:$0xff]  }
  0xb0   : > { %v3863_v41 = vld [vmem:[%s4783_s14 + $0x1c4] ss:$16 sps:$4 sm:$0xff]   ;;  %v3865_v42 = vld [vmem:[%s4783_s14 + $0x1cc] ss:$16 sps:$4 sm:$0xff]   ;;  %v3867_v43 = vld [vmem:[%s4783_s14 + $0x1c0] ss:$16 sps:$4 sm:$0xff]  }
  0xb1   : > { %v3868_v44 = vld [vmem:[%s4783_s14 + $0x1c8] ss:$16 sps:$4 sm:$0xff]   ;;  %v3869_v45 = vld [vmem:[%s4783_s14 + $0x1a4] ss:$16 sps:$4 sm:$0xff]   ;;  %v3871_v46 = vld [vmem:[%s4783_s14 + $0x1ac] ss:$16 sps:$4 sm:$0xff]  }
  0xb2   : > { %v3873_v47 = vld [vmem:[%s4783_s14 + $0x1a0] ss:$16 sps:$4 sm:$0xff]   ;;  %v3874_v48 = vld [vmem:[%s4783_s14 + $0x1a8] ss:$16 sps:$4 sm:$0xff]   ;;  %v3875_v49 = vld [vmem:[%s4783_s14 + $0x184] ss:$16 sps:$4 sm:$0xff]  }
  0xb3   : > { %v3877_v50 = vld [vmem:[%s4783_s14 + $0x18c] ss:$16 sps:$4 sm:$0xff]   ;;  %v3879_v51 = vld [vmem:[%s4783_s14 + $0x180] ss:$16 sps:$4 sm:$0xff]   ;;  %v3880_v52 = vld [vmem:[%s4783_s14 + $0x188] ss:$16 sps:$4 sm:$0xff]  }
  0xb4   : > { %v3881_v53 = vld [vmem:[%s4783_s14 + $0x164] ss:$16 sps:$4 sm:$0xff]   ;;  %v3883_v54 = vld [vmem:[%s4783_s14 + $0x16c] ss:$16 sps:$4 sm:$0xff]   ;;  %v3885_v55 = vld [vmem:[%s4783_s14 + $0x160] ss:$16 sps:$4 sm:$0xff]  }
  0xb5   : > { %1386 = vmatpush1.bf16.xpose.msra.mxu0 %v3825_v11  ;;  %1427 = vmatpush1.bf16.xpose.msra.mxu1 %v3826_v12  ;;  %v3886_v56 = vld [vmem:[%s4783_s14 + $0x168] ss:$16 sps:$4 sm:$0xff]   ;;  %v3887_v57 = vld [vmem:[%s4783_s14 + $0x144] ss:$16 sps:$4 sm:$0xff]   ;;  %v3889_v58 = vld [vmem:[%s4783_s14 + $0x14c] ss:$16 sps:$4 sm:$0xff]  }
  0xb6   : > { %1387 = vmatprep.subr.bf16.mxu0 %v3827_v13  ;;  %1428 = vmatprep.subr.bf16.mxu1 %v3829_v14  ;;  %v3891_v59 = vld [vmem:[%s4783_s14 + $0x140] ss:$16 sps:$4 sm:$0xff]   ;;  %v3892_v60 = vld [vmem:[%s4783_s14 + $0x148] ss:$16 sps:$4 sm:$0xff]   ;;  %v3893_v61 = vld [vmem:[%s4783_s14 + $0x124] ss:$16 sps:$4 sm:$0xff]  }
  0xb7   : > { %v3895_v62 = vld [vmem:[%s4783_s14 + $0x12c] ss:$16 sps:$4 sm:$0xff]   ;;  %v3897_v63 = vld [vmem:[%s4783_s14 + $0x120] ss:$16 sps:$4 sm:$0xff]   ;;  %v3898_v0 = vld [vmem:[%s4783_s14 + $0x128] ss:$16 sps:$4 sm:$0xff]  }
  0xb8   : > { %v3899_v1 = vld [vmem:[%s4783_s14 + $0x104] ss:$16 sps:$4 sm:$0xff]   ;;  %v3901_v2 = vld [vmem:[%s4783_s14 + $0x10c] ss:$16 sps:$4 sm:$0xff]   ;;  %v3903_v3 = vld [vmem:[%s4783_s14 + $0x100] ss:$16 sps:$4 sm:$0xff]  }
  0xb9   : > { %v3904_v4 = vld [vmem:[%s4783_s14 + $0x108] ss:$16 sps:$4 sm:$0xff]   ;;  %v3911_v5 = vld [vmem:[%s4783_s14 + $0x2e4] ss:$16 sps:$4 sm:$0xff]   ;;  %v3914_v6 = vld [vmem:[%s4783_s14 + $0x2ec] ss:$16 sps:$4 sm:$0xff]  }
  0xba   : > { %v3909_v7 = vld [vmem:[%s4783_s14 + $0x2e0] ss:$16 sps:$4 sm:$0xff]   ;;  %v3912_v10 = vld [vmem:[%s4783_s14 + $0x2e8] ss:$16 sps:$4 sm:$0xff]   ;;  %v3917_v11 = vld [vmem:[%s4783_s14 + $0x2c4] ss:$16 sps:$4 sm:$0xff]  }
  0xbb   : > { %v3920_v12 = vld [vmem:[%s4783_s14 + $0x2cc] ss:$16 sps:$4 sm:$0xff]   ;;  %v3915_v13 = vld [vmem:[%s4783_s14 + $0x2c0] ss:$16 sps:$4 sm:$0xff]   ;;  %v3918_v14 = vld [vmem:[%s4783_s14 + $0x2c8] ss:$16 sps:$4 sm:$0xff]  }
  0xbc   : > { %v3941_v27 = vld [vmem:[%s4783_s14 + $0x244] ss:$16 sps:$4 sm:$0xff]   ;;  %v3939_v29 = vld [vmem:[%s4783_s14 + $0x240] ss:$16 sps:$4 sm:$0xff]  }
  0xbd   : > { %1388 = vmatpush1.bf16.xpose.msra.mxu0 %v3831_v15  ;;  %1429 = vmatpush1.bf16.xpose.msra.mxu1 %v3832_v16  ;;  %v3923_v15 = vld [vmem:[%s4783_s14 + $0x2a4] ss:$16 sps:$4 sm:$0xff]   ;;  %v3926_v16 = vld [vmem:[%s4783_s14 + $0x2ac] ss:$16 sps:$4 sm:$0xff]  }
  0xbe   : > { %1389 = vmatprep.subr.bf16.mxu0 %v3833_v17  ;;  %1430 = vmatprep.subr.bf16.mxu1 %v3835_v18  ;;  %v3921_v17 = vld [vmem:[%s4783_s14 + $0x2a0] ss:$16 sps:$4 sm:$0xff]   ;;  %v3924_v18 = vld [vmem:[%s4783_s14 + $0x2a8] ss:$16 sps:$4 sm:$0xff]  }
  0xc5   : > { %1390 = vmatpush1.bf16.xpose.msra.mxu0 %v3837_v19  ;;  %1431 = vmatpush1.bf16.xpose.msra.mxu1 %v3838_v20  ;;  %v3929_v19 = vld [vmem:[%s4783_s14 + $0x284] ss:$16 sps:$4 sm:$0xff]   ;;  %v3932_v20 = vld [vmem:[%s4783_s14 + $0x28c] ss:$16 sps:$4 sm:$0xff]  }
  0xc6   : > { %1391 = vmatprep.subr.bf16.mxu0 %v3839_v21  ;;  %1432 = vmatprep.subr.bf16.mxu1 %v3841_v22  ;;  %v3927_v21 = vld [vmem:[%s4783_s14 + $0x280] ss:$16 sps:$4 sm:$0xff]   ;;  %v3930_v22 = vld [vmem:[%s4783_s14 + $0x288] ss:$16 sps:$4 sm:$0xff]  }
  0xcd   : > { %1392 = vmatpush1.bf16.xpose.msra.mxu0 %v3843_v23  ;;  %1433 = vmatpush1.bf16.xpose.msra.mxu1 %v3844_v24  ;;  %v3935_v23 = vld [vmem:[%s4783_s14 + $0x264] ss:$16 sps:$4 sm:$0xff]   ;;  %v3938_v24 = vld [vmem:[%s4783_s14 + $0x26c] ss:$16 sps:$4 sm:$0xff]  }
  0xce   : > { %1393 = vmatprep.subr.bf16.mxu0 %v3845_v25  ;;  %1434 = vmatprep.subr.bf16.mxu1 %v3847_v26  ;;  %v3933_v25 = vld [vmem:[%s4783_s14 + $0x260] ss:$16 sps:$4 sm:$0xff]   ;;  %v3936_v26 = vld [vmem:[%s4783_s14 + $0x268] ss:$16 sps:$4 sm:$0xff]  }
  0xd5   : > { %1394 = vmatpush1.bf16.xpose.msra.mxu0 %v3849_v31  ;;  %1435 = vmatpush1.bf16.xpose.msra.mxu1 %v3850_v32  ;;  %v3947_v31 = vld [vmem:[%s4783_s14 + $0x224] ss:$16 sps:$4 sm:$0xff]   ;;  %v3950_v32 = vld [vmem:[%s4783_s14 + $0x22c] ss:$16 sps:$4 sm:$0xff]  }
  0xd6   : > { %1395 = vmatprep.subr.bf16.mxu0 %v3851_v33  ;;  %1436 = vmatprep.subr.bf16.mxu1 %v3853_v34  ;;  %v3945_v33 = vld [vmem:[%s4783_s14 + $0x220] ss:$16 sps:$4 sm:$0xff]   ;;  %v3948_v34 = vld [vmem:[%s4783_s14 + $0x228] ss:$16 sps:$4 sm:$0xff]  }
  0xdd   : > { %1396 = vmatpush1.bf16.xpose.msra.mxu0 %v3855_v35  ;;  %1437 = vmatpush1.bf16.xpose.msra.mxu1 %v3856_v36  ;;  %v3953_v35 = vld [vmem:[%s4783_s14 + $0x204] ss:$16 sps:$4 sm:$0xff]   ;;  %v3956_v36 = vld [vmem:[%s4783_s14 + $0x20c] ss:$16 sps:$4 sm:$0xff]  }
  0xde   : > { %1397 = vmatprep.subr.bf16.mxu0 %v3857_v37  ;;  %1438 = vmatprep.subr.bf16.mxu1 %v3859_v38  ;;  %v3951_v37 = vld [vmem:[%s4783_s14 + $0x200] ss:$16 sps:$4 sm:$0xff]   ;;  %v3954_v38 = vld [vmem:[%s4783_s14 + $0x208] ss:$16 sps:$4 sm:$0xff]  }
  0xe5   : > { %1398 = vmatpush2.bf16.xpose.msra.mxu0 %v3861_v39  ;;  %1439 = vmatpush2.bf16.xpose.msra.mxu1 %v3862_v40  ;;  %v3959_v39 = vld [vmem:[%s4783_s14 + $0x3e4] ss:$16 sps:$4 sm:$0xff]   ;;  %v3962_v40 = vld [vmem:[%s4783_s14 + $0x3ec] ss:$16 sps:$4 sm:$0xff]  }
  0xe6   : > { %1399 = vmatprep.subr.bf16.mxu0 %v3863_v41  ;;  %1440 = vmatprep.subr.bf16.mxu1 %v3865_v42  ;;  %v3957_v41 = vld [vmem:[%s4783_s14 + $0x3e0] ss:$16 sps:$4 sm:$0xff]   ;;  %v3960_v42 = vld [vmem:[%s4783_s14 + $0x3e8] ss:$16 sps:$4 sm:$0xff]  }
  0xed   : > { %1400 = vmatpush2.bf16.xpose.msra.mxu0 %v3867_v43  ;;  %1441 = vmatpush2.bf16.xpose.msra.mxu1 %v3868_v44  ;;  %v3965_v43 = vld [vmem:[%s4783_s14 + $0x3c4] ss:$16 sps:$4 sm:$0xff]   ;;  %v3968_v44 = vld [vmem:[%s4783_s14 + $0x3cc] ss:$16 sps:$4 sm:$0xff]  }
  0xee   : > { %1401 = vmatprep.subr.bf16.mxu0 %v3869_v45  ;;  %1442 = vmatprep.subr.bf16.mxu1 %v3871_v46  ;;  %v3963_v45 = vld [vmem:[%s4783_s14 + $0x3c0] ss:$16 sps:$4 sm:$0xff]   ;;  %v3966_v46 = vld [vmem:[%s4783_s14 + $0x3c8] ss:$16 sps:$4 sm:$0xff]  }
  0xf5   : > { %1402 = vmatpush2.bf16.xpose.msra.mxu0 %v3873_v47  ;;  %1443 = vmatpush2.bf16.xpose.msra.mxu1 %v3874_v48  ;;  %v3971_v47 = vld [vmem:[%s4783_s14 + $0x3a4] ss:$16 sps:$4 sm:$0xff]   ;;  %v3974_v48 = vld [vmem:[%s4783_s14 + $0x3ac] ss:$16 sps:$4 sm:$0xff]  }
  0xf6   : > { %1403 = vmatprep.subr.bf16.mxu0 %v3875_v49  ;;  %1444 = vmatprep.subr.bf16.mxu1 %v3877_v50  ;;  %v3969_v49 = vld [vmem:[%s4783_s14 + $0x3a0] ss:$16 sps:$4 sm:$0xff]   ;;  %v3972_v50 = vld [vmem:[%s4783_s14 + $0x3a8] ss:$16 sps:$4 sm:$0xff]  }
  0xfd   : > { %1404 = vmatpush2.bf16.xpose.msra.mxu0 %v3879_v51  ;;  %1445 = vmatpush2.bf16.xpose.msra.mxu1 %v3880_v52  ;;  %v3977_v51 = vld [vmem:[%s4783_s14 + $0x384] ss:$16 sps:$4 sm:$0xff]   ;;  %v3980_v52 = vld [vmem:[%s4783_s14 + $0x38c] ss:$16 sps:$4 sm:$0xff]  }
  0xfe   : > { %1405 = vmatprep.subr.bf16.mxu0 %v3881_v53  ;;  %1446 = vmatprep.subr.bf16.mxu1 %v3883_v54  ;;  %v3975_v53 = vld [vmem:[%s4783_s14 + $0x380] ss:$16 sps:$4 sm:$0xff]   ;;  %v3978_v54 = vld [vmem:[%s4783_s14 + $0x388] ss:$16 sps:$4 sm:$0xff]  }
 0x105   : > { %1406 = vmatpush2.bf16.xpose.msra.mxu0 %v3885_v55  ;;  %1447 = vmatpush2.bf16.xpose.msra.mxu1 %v3886_v56  ;;  %v3983_v55 = vld [vmem:[%s4783_s14 + $0x364] ss:$16 sps:$4 sm:$0xff]   ;;  %v3986_v56 = vld [vmem:[%s4783_s14 + $0x36c] ss:$16 sps:$4 sm:$0xff]  }
 0x106   : > { %1407 = vmatprep.subr.bf16.mxu0 %v3887_v57  ;;  %1448 = vmatprep.subr.bf16.mxu1 %v3889_v58  ;;  %v3981_v57 = vld [vmem:[%s4783_s14 + $0x360] ss:$16 sps:$4 sm:$0xff]   ;;  %v3984_v58 = vld [vmem:[%s4783_s14 + $0x368] ss:$16 sps:$4 sm:$0xff]  }
 0x10d   : > { %1408 = vmatpush2.bf16.xpose.msra.mxu0 %v3891_v59  ;;  %1449 = vmatpush2.bf16.xpose.msra.mxu1 %v3892_v60  ;;  %v3989_v59 = vld [vmem:[%s4783_s14 + $0x344] ss:$16 sps:$4 sm:$0xff]   ;;  %v3992_v60 = vld [vmem:[%s4783_s14 + $0x34c] ss:$16 sps:$4 sm:$0xff]  }
 0x10e   : > { %1409 = vmatprep.subr.bf16.mxu0 %v3893_v61  ;;  %1450 = vmatprep.subr.bf16.mxu1 %v3895_v62  ;;  %v3987_v61 = vld [vmem:[%s4783_s14 + $0x340] ss:$16 sps:$4 sm:$0xff]   ;;  %v3990_v62 = vld [vmem:[%s4783_s14 + $0x348] ss:$16 sps:$4 sm:$0xff]  }
 0x115   : > { %1410 = vmatpush2.bf16.xpose.msra.mxu0 %v3897_v63  ;;  %1451 = vmatpush2.bf16.xpose.msra.mxu1 %v3898_v0  ;;  %v3995_v63 = vld [vmem:[%s4783_s14 + $0x324] ss:$16 sps:$4 sm:$0xff]   ;;  %v3998_v0 = vld [vmem:[%s4783_s14 + $0x32c] ss:$16 sps:$4 sm:$0xff]  }
 0x116   : > { %1411 = vmatprep.subr.bf16.mxu0 %v3899_v1  ;;  %1452 = vmatprep.subr.bf16.mxu1 %v3901_v2  ;;  %v3993_v1 = vld [vmem:[%s4783_s14 + $0x320] ss:$16 sps:$4 sm:$0xff]   ;;  %v3996_v2 = vld [vmem:[%s4783_s14 + $0x328] ss:$16 sps:$4 sm:$0xff]  }
 0x11d   : > { %1412 = vmatpush2.bf16.xpose.msra.mxu0 %v3903_v3  ;;  %1453 = vmatpush2.bf16.xpose.msra.mxu1 %v3904_v4  ;;  %v4001_v3 = vld [vmem:[%s4783_s14 + $0x304] ss:$16 sps:$4 sm:$0xff]   ;;  %v4004_v4 = vld [vmem:[%s4783_s14 + $0x30c] ss:$16 sps:$4 sm:$0xff]  }
 0x11e   : > { %1463 = vmatprep.subr.bf16.mxu0 %v3911_v5  ;;  %1504 = vmatprep.subr.bf16.mxu1 %v3914_v6  ;;  %v3999_v5 = vld [vmem:[%s4783_s14 + $0x300] ss:$16 sps:$4 sm:$0xff]   ;;  %v4002_v6 = vld [vmem:[%s4783_s14 + $0x308] ss:$16 sps:$4 sm:$0xff]  }
 0x124   : > { %1414 = vmatmul.mubr.bf16.vlgmr.msra.gmra.mxu0 %v4898_v8  ;;  %1455 = vmatmul.mubr.bf16.vlgmr.msra.gmra.mxu1 %v4902_v9 }
 0x125   : > { %1464 = vmatpush1.bf16.xpose.msra.mxu0 %v3909_v7  ;;  %1505 = vmatpush1.bf16.xpose.msra.mxu1 %v3912_v10  ;;  %v4007_v7 = vld [vmem:[%s4783_s14 + $0x4e4] ss:$16 sps:$4 sm:$0xff]   ;;  %v4010_v10 = vld [vmem:[%s4783_s14 + $0x4ec] ss:$16 sps:$4 sm:$0xff]  }
 0x126   : > { %1465 = vmatprep.subr.bf16.mxu0 %v3917_v11  ;;  %1506 = vmatprep.subr.bf16.mxu1 %v3920_v12  ;;  %v4971_v11 = vld [vmem:[#allocation3 + $0x10] sm:$0xff]  ;;  %v4973_v12 = vld [vmem:[#allocation3 + $0x18] sm:$0xff] }
 0x127   : > { %1495 = vmatprep.mubr.bf16.mxu0 %v4845_v28  ;;  %1536 = vmatprep.mubr.bf16.mxu1 %v4851_v30  ;;  %v3944_v28 = vld [vmem:[%s4783_s14 + $0x24c] ss:$16 sps:$4 sm:$0xff]   ;;  %v3942_v30 = vld [vmem:[%s4783_s14 + $0x248] ss:$16 sps:$4 sm:$0xff]  }
 0x12d   : > { %1466 = vmatpush1.bf16.xpose.msra.mxu0 %v3915_v13  ;;  %1507 = vmatpush1.bf16.xpose.msra.mxu1 %v3918_v14  ;;  %v4005_v13 = vld [vmem:[%s4783_s14 + $0x4e0] ss:$16 sps:$4 sm:$0xff]   ;;  %v4008_v14 = vld [vmem:[%s4783_s14 + $0x4e8] ss:$16 sps:$4 sm:$0xff]  }
 0x12e   : > { %1467 = vmatprep.subr.bf16.mxu0 %v3923_v15  ;;  %1508 = vmatprep.subr.bf16.mxu1 %v3926_v16  ;;  %v4013_v15 = vld [vmem:[%s4783_s14 + $0x4c4] ss:$16 sps:$4 sm:$0xff]   ;;  %v4016_v16 = vld [vmem:[%s4783_s14 + $0x4cc] ss:$16 sps:$4 sm:$0xff]  }
 0x135   : > { %1468 = vmatpush1.bf16.xpose.msra.mxu0 %v3921_v17  ;;  %1509 = vmatpush1.bf16.xpose.msra.mxu1 %v3924_v18  ;;  %v4981_v17 = vcombine.high %v4971_v11, %v4971_v11  ;;  %v4985_v18 = vcombine.high %v4973_v12, %v4973_v12 }
 0x136   : > { %1469 = vmatprep.subr.bf16.mxu0 %v3929_v19  ;;  %1510 = vmatprep.subr.bf16.mxu1 %v3932_v20  ;;  %v4011_v19 = vld [vmem:[%s4783_s14 + $0x4c0] ss:$16 sps:$4 sm:$0xff]   ;;  %v4014_v20 = vld [vmem:[%s4783_s14 + $0x4c8] ss:$16 sps:$4 sm:$0xff]  }
 0x13d   : > { %1470 = vmatpush1.bf16.xpose.msra.mxu0 %v3927_v21  ;;  %1511 = vmatpush1.bf16.xpose.msra.mxu1 %v3930_v22  ;;  %v4019_v21 = vld [vmem:[%s4783_s14 + $0x4a4] ss:$16 sps:$4 sm:$0xff]   ;;  %v4020_v22 = vld [vmem:[%s4783_s14 + $0x4a8] ss:$16 sps:$4 sm:$0xff]  }
 0x13e   : > { %1471 = vmatprep.subr.bf16.mxu0 %v3935_v23  ;;  %1512 = vmatprep.subr.bf16.mxu1 %v3938_v24  ;;  %v4025_v23 = vld [vmem:[%s4783_s14 + $0x484] ss:$16 sps:$4 sm:$0xff]   ;;  %v4028_v24 = vld [vmem:[%s4783_s14 + $0x48c] ss:$16 sps:$4 sm:$0xff]  }
 0x145   : > { %1472 = vmatpush1.bf16.xpose.msra.mxu0 %v3933_v25  ;;  %1513 = vmatpush1.bf16.xpose.msra.mxu1 %v3936_v26  ;;  %v4023_v25 = vld [vmem:[%s4783_s14 + $0x480] ss:$16 sps:$4 sm:$0xff]   ;;  %v4026_v26 = vld [vmem:[%s4783_s14 + $0x488] ss:$16 sps:$4 sm:$0xff]  }
 0x146   : > { %1473 = vmatprep.subr.bf16.mxu0 %v3941_v27  ;;  %1514 = vmatprep.subr.bf16.mxu1 %v3944_v28  ;;  %v4031_v27 = vld [vmem:[%s4783_s14 + $0x464] ss:$16 sps:$4 sm:$0xff]   ;;  %v4034_v28 = vld [vmem:[%s4783_s14 + $0x46c] ss:$16 sps:$4 sm:$0xff]  }
 0x14d   : > { %1474 = vmatpush1.bf16.xpose.msra.mxu0 %v3939_v29  ;;  %1515 = vmatpush1.bf16.xpose.msra.mxu1 %v3942_v30  ;;  %v4029_v29 = vld [vmem:[%s4783_s14 + $0x460] ss:$16 sps:$4 sm:$0xff]   ;;  %v4032_v30 = vld [vmem:[%s4783_s14 + $0x468] ss:$16 sps:$4 sm:$0xff]  }
 0x14e   : > { %1475 = vmatprep.subr.bf16.mxu0 %v3947_v31  ;;  %1516 = vmatprep.subr.bf16.mxu1 %v3950_v32  ;;  %v4037_v31 = vld [vmem:[%s4783_s14 + $0x444] ss:$16 sps:$4 sm:$0xff]   ;;  %v4040_v32 = vld [vmem:[%s4783_s14 + $0x44c] ss:$16 sps:$4 sm:$0xff]  }
 0x155   : > { %1476 = vmatpush1.bf16.xpose.msra.mxu0 %v3945_v33  ;;  %1517 = vmatpush1.bf16.xpose.msra.mxu1 %v3948_v34  ;;  %v4035_v33 = vld [vmem:[%s4783_s14 + $0x440] ss:$16 sps:$4 sm:$0xff]   ;;  %v4038_v34 = vld [vmem:[%s4783_s14 + $0x448] ss:$16 sps:$4 sm:$0xff]  }
 0x156   : > { %1477 = vmatprep.subr.bf16.mxu0 %v3953_v35  ;;  %1518 = vmatprep.subr.bf16.mxu1 %v3956_v36  ;;  %v4043_v35 = vld [vmem:[%s4783_s14 + $0x424] ss:$16 sps:$4 sm:$0xff]   ;;  %v4046_v36 = vld [vmem:[%s4783_s14 + $0x42c] ss:$16 sps:$4 sm:$0xff]  }
 0x15d   : > { %1478 = vmatpush1.bf16.xpose.msra.mxu0 %v3951_v37  ;;  %1519 = vmatpush1.bf16.xpose.msra.mxu1 %v3954_v38  ;;  %v4041_v37 = vld [vmem:[%s4783_s14 + $0x420] ss:$16 sps:$4 sm:$0xff]   ;;  %v4044_v38 = vld [vmem:[%s4783_s14 + $0x428] ss:$16 sps:$4 sm:$0xff]  }
 0x15e   : > { %1479 = vmatprep.subr.bf16.mxu0 %v3959_v39  ;;  %1520 = vmatprep.subr.bf16.mxu1 %v3962_v40  ;;  %v4049_v39 = vld [vmem:[%s4783_s14 + $0x404] ss:$16 sps:$4 sm:$0xff]   ;;  %v4052_v40 = vld [vmem:[%s4783_s14 + $0x40c] ss:$16 sps:$4 sm:$0xff]  }
 0x165   : > { %1480 = vmatpush2.bf16.xpose.msra.mxu0 %v3957_v41  ;;  %1521 = vmatpush2.bf16.xpose.msra.mxu1 %v3960_v42  ;;  %v4047_v41 = vld [vmem:[%s4783_s14 + $0x400] ss:$16 sps:$4 sm:$0xff]   ;;  %v4050_v42 = vld [vmem:[%s4783_s14 + $0x408] ss:$16 sps:$4 sm:$0xff]  }
 0x166   : > { %1481 = vmatprep.subr.bf16.mxu0 %v3965_v43  ;;  %1522 = vmatprep.subr.bf16.mxu1 %v3968_v44  ;;  %v4055_v43 = vld [vmem:[%s4783_s14 + $0x5e4] ss:$16 sps:$4 sm:$0xff]   ;;  %v4058_v44 = vld [vmem:[%s4783_s14 + $0x5ec] ss:$16 sps:$4 sm:$0xff]  }
 0x16d   : > { %1482 = vmatpush2.bf16.xpose.msra.mxu0 %v3963_v45  ;;  %1523 = vmatpush2.bf16.xpose.msra.mxu1 %v3966_v46  ;;  %v4053_v45 = vld [vmem:[%s4783_s14 + $0x5e0] ss:$16 sps:$4 sm:$0xff]   ;;  %v4056_v46 = vld [vmem:[%s4783_s14 + $0x5e8] ss:$16 sps:$4 sm:$0xff]  }
 0x16e   : > { %1483 = vmatprep.subr.bf16.mxu0 %v3971_v47  ;;  %1524 = vmatprep.subr.bf16.mxu1 %v3974_v48  ;;  %v4061_v47 = vld [vmem:[%s4783_s14 + $0x5c4] ss:$16 sps:$4 sm:$0xff]   ;;  %v4064_v48 = vld [vmem:[%s4783_s14 + $0x5cc] ss:$16 sps:$4 sm:$0xff]  }
 0x175   : > { %1484 = vmatpush2.bf16.xpose.msra.mxu0 %v3969_v49  ;;  %1525 = vmatpush2.bf16.xpose.msra.mxu1 %v3972_v50 }
 0x176   : > { %1485 = vmatprep.subr.bf16.mxu0 %v3977_v51  ;;  %1526 = vmatprep.subr.bf16.mxu1 %v3980_v52  ;;  %v2363_v51 = vld [vmem:[#allocation2 + $0x30] sm:$0xff] }
 0x17d   : > { %1486 = vmatpush2.bf16.xpose.msra.mxu0 %v3975_v53  ;;  %1527 = vmatpush2.bf16.xpose.msra.mxu1 %v3978_v54 }
 0x17e   : > { %1487 = vmatprep.subr.bf16.mxu0 %v3983_v55  ;;  %1528 = vmatprep.subr.bf16.mxu1 %v3986_v56  ;;  %v2364_v55 = vld [vmem:[#allocation2] sm:$0xff] }
 0x185   : > { %1488 = vmatpush2.bf16.xpose.msra.mxu0 %v3981_v57  ;;  %1529 = vmatpush2.bf16.xpose.msra.mxu1 %v3984_v58 }
 0x186   : > { %1489 = vmatprep.subr.bf16.mxu0 %v3989_v59  ;;  %1530 = vmatprep.subr.bf16.mxu1 %v3992_v60 }
 0x18d   : > { %1490 = vmatpush2.bf16.xpose.msra.mxu0 %v3987_v61  ;;  %1531 = vmatpush2.bf16.xpose.msra.mxu1 %v3990_v62  ;;  %v4059_v61 = vld [vmem:[%s4783_s14 + $0x5c0] ss:$16 sps:$4 sm:$0xff]   ;;  %v4062_v62 = vld [vmem:[%s4783_s14 + $0x5c8] ss:$16 sps:$4 sm:$0xff]  }
 0x18e   : > { %1491 = vmatprep.subr.bf16.mxu0 %v3995_v63  ;;  %1532 = vmatprep.subr.bf16.mxu1 %v3998_v0 }
 0x195   : > { %1492 = vmatpush2.bf16.xpose.msra.mxu0 %v3993_v1  ;;  %1533 = vmatpush2.bf16.xpose.msra.mxu1 %v3996_v2  ;;  %v4067_v1 = vld [vmem:[%s4783_s14 + $0x5a4] ss:$16 sps:$4 sm:$0xff]   ;;  %v4070_v2 = vld [vmem:[%s4783_s14 + $0x5ac] ss:$16 sps:$4 sm:$0xff]  }
 0x196   : > { %1493 = vmatprep.subr.bf16.mxu0 %v4001_v3  ;;  %1534 = vmatprep.subr.bf16.mxu1 %v4004_v4  ;;  %v4065_v3 = vld [vmem:[%s4783_s14 + $0x5a0] ss:$16 sps:$4 sm:$0xff]   ;;  %v4068_v4 = vld [vmem:[%s4783_s14 + $0x5a8] ss:$16 sps:$4 sm:$0xff]  }
 0x19d   : > { %1494 = vmatpush2.bf16.xpose.msra.mxu0 %v3999_v5  ;;  %1535 = vmatpush2.bf16.xpose.msra.mxu1 %v4002_v6  ;;  %v4073_v5 = vld [vmem:[%s4783_s14 + $0x584] ss:$16 sps:$4 sm:$0xff]   ;;  %v4076_v6 = vld [vmem:[%s4783_s14 + $0x58c] ss:$16 sps:$4 sm:$0xff]  }
 0x19e   : > { %2199 = vmatprep.subr.bf16.mxu0 %v4007_v7  ;;  %2240 = vmatprep.subr.bf16.mxu1 %v4010_v10  ;;  %v4071_v7 = vld [vmem:[%s4783_s14 + $0x580] ss:$16 sps:$4 sm:$0xff]   ;;  %v4074_v10 = vld [vmem:[%s4783_s14 + $0x588] ss:$16 sps:$4 sm:$0xff]  }
 0x1a4   : > { %1496 = vmatmul.mubr.bf16.vlgmr.msra.gmra.mxu0 %v4898_v8  ;;  %1537 = vmatmul.mubr.bf16.vlgmr.msra.gmra.mxu1 %v4902_v9  ;;  %v4022_v8 = vld [vmem:[%s4783_s14 + $0x4ac] ss:$16 sps:$4 sm:$0xff]   ;;  %v4017_v9 = vld [vmem:[%s4783_s14 + $0x4a0] ss:$16 sps:$4 sm:$0xff]  }
 0x1a5   : > { %2200 = vmatpush1.bf16.xpose.msra.mxu0 %v4005_v13  ;;  %2241 = vmatpush1.bf16.xpose.msra.mxu1 %v4008_v14  ;;  %v4079_v13 = vld [vmem:[%s4783_s14 + $0x564] ss:$16 sps:$4 sm:$0xff]   ;;  %v4082_v14 = vld [vmem:[%s4783_s14 + $0x56c] ss:$16 sps:$4 sm:$0xff]  }
 0x1a6   : > { %2201 = vmatprep.subr.bf16.mxu0 %v4013_v15  ;;  %2242 = vmatprep.subr.bf16.mxu1 %v4016_v16  ;;  %v4077_v15 = vld [vmem:[%s4783_s14 + $0x560] ss:$16 sps:$4 sm:$0xff]   ;;  %v4080_v16 = vld [vmem:[%s4783_s14 + $0x568] ss:$16 sps:$4 sm:$0xff]  }
 0x1a7   : > { %2231 = vmatprep.mubr.bf16.mxu0 %v4981_v17  ;;  %2272 = vmatprep.mubr.bf16.mxu1 %v4985_v18 }
 0x1ad   : > { %2202 = vmatpush1.bf16.xpose.msra.mxu0 %v4011_v19  ;;  %2243 = vmatpush1.bf16.xpose.msra.mxu1 %v4014_v20  ;;  %v4085_v19 = vld [vmem:[%s4783_s14 + $0x544] ss:$16 sps:$4 sm:$0xff]   ;;  %v4088_v20 = vld [vmem:[%s4783_s14 + $0x54c] ss:$16 sps:$4 sm:$0xff]  }
 0x1ae   : > { %2203 = vmatprep.subr.bf16.mxu0 %v4019_v21  ;;  %2244 = vmatprep.subr.bf16.mxu1 %v4022_v8  ;;  %v4083_v21 = vld [vmem:[%s4783_s14 + $0x540] ss:$16 sps:$4 sm:$0xff]   ;;  %v4086_v8 = vld [vmem:[%s4783_s14 + $0x548] ss:$16 sps:$4 sm:$0xff]  }
 0x1b5   : > { %2204 = vmatpush1.bf16.xpose.msra.mxu0 %v4017_v9  ;;  %2245 = vmatpush1.bf16.xpose.msra.mxu1 %v4020_v22  ;;  %v4091_v9 = vld [vmem:[%s4783_s14 + $0x524] ss:$16 sps:$4 sm:$0xff]   ;;  %v4094_v22 = vld [vmem:[%s4783_s14 + $0x52c] ss:$16 sps:$4 sm:$0xff]  }
 0x1b6   : > { %2205 = vmatprep.subr.bf16.mxu0 %v4025_v23  ;;  %2246 = vmatprep.subr.bf16.mxu1 %v4028_v24  ;;  %v4089_v23 = vld [vmem:[%s4783_s14 + $0x520] ss:$16 sps:$4 sm:$0xff]   ;;  %v4092_v24 = vld [vmem:[%s4783_s14 + $0x528] ss:$16 sps:$4 sm:$0xff]  }
 0x1bd   : > { %2206 = vmatpush1.bf16.xpose.msra.mxu0 %v4023_v25  ;;  %2247 = vmatpush1.bf16.xpose.msra.mxu1 %v4026_v26  ;;  %v4097_v25 = vld [vmem:[%s4783_s14 + $0x504] ss:$16 sps:$4 sm:$0xff]   ;;  %v4100_v26 = vld [vmem:[%s4783_s14 + $0x50c] ss:$16 sps:$4 sm:$0xff]  }
 0x1be   : > { %2207 = vmatprep.subr.bf16.mxu0 %v4031_v27  ;;  %2248 = vmatprep.subr.bf16.mxu1 %v4034_v28  ;;  %v4095_v27 = vld [vmem:[%s4783_s14 + $0x500] ss:$16 sps:$4 sm:$0xff]   ;;  %v4098_v28 = vld [vmem:[%s4783_s14 + $0x508] ss:$16 sps:$4 sm:$0xff]  }
 0x1c5   : > { %2208 = vmatpush1.bf16.xpose.msra.mxu0 %v4029_v29  ;;  %2249 = vmatpush1.bf16.xpose.msra.mxu1 %v4032_v30  ;;  %v4107_v29 = vld [vmem:[%s4783_s14 + $0x6e4] ss:$16 sps:$4 sm:$0xff]   ;;  %v4110_v30 = vld [vmem:[%s4783_s14 + $0x6ec] ss:$16 sps:$4 sm:$0xff]  }
 0x1c6   : > { %2209 = vmatprep.subr.bf16.mxu0 %v4037_v31  ;;  %2250 = vmatprep.subr.bf16.mxu1 %v4040_v32  ;;  %v5053_v31 = vcombine.low %v4971_v11, %v4971_v11  ;;  %v5057_v32 = vcombine.low %v4973_v12, %v4973_v12  ;;  %v4111_v11 = vld [vmem:[%s4783_s14 + $0x6c0] ss:$16 sps:$4 sm:$0xff]   ;;  %v4114_v12 = vld [vmem:[%s4783_s14 + $0x6c8] ss:$16 sps:$4 sm:$0xff]  }
 0x1cd   : > { %2210 = vmatpush1.bf16.xpose.msra.mxu0 %v4035_v33  ;;  %2251 = vmatpush1.bf16.xpose.msra.mxu1 %v4038_v34  ;;  %v4105_v33 = vld [vmem:[%s4783_s14 + $0x6e0] ss:$16 sps:$4 sm:$0xff]   ;;  %v4108_v34 = vld [vmem:[%s4783_s14 + $0x6e8] ss:$16 sps:$4 sm:$0xff]  }
 0x1ce   : > { %2211 = vmatprep.subr.bf16.mxu0 %v4043_v35  ;;  %2252 = vmatprep.subr.bf16.mxu1 %v4046_v36  ;;  %v4113_v35 = vld [vmem:[%s4783_s14 + $0x6c4] ss:$16 sps:$4 sm:$0xff]   ;;  %v4116_v36 = vld [vmem:[%s4783_s14 + $0x6cc] ss:$16 sps:$4 sm:$0xff]  }
 0x1d5   : > { %2212 = vmatpush1.bf16.xpose.msra.mxu0 %v4041_v37  ;;  %2253 = vmatpush1.bf16.xpose.msra.mxu1 %v4044_v38  ;;  %v4119_v37 = vld [vmem:[%s4783_s14 + $0x6a4] ss:$16 sps:$4 sm:$0xff]   ;;  %v4122_v38 = vld [vmem:[%s4783_s14 + $0x6ac] ss:$16 sps:$4 sm:$0xff]  }
 0x1d6   : > { %2213 = vmatprep.subr.bf16.mxu0 %v4049_v39  ;;  %2254 = vmatprep.subr.bf16.mxu1 %v4052_v40  ;;  %v4117_v39 = vld [vmem:[%s4783_s14 + $0x6a0] ss:$16 sps:$4 sm:$0xff]   ;;  %v4120_v40 = vld [vmem:[%s4783_s14 + $0x6a8] ss:$16 sps:$4 sm:$0xff]  }
 0x1dd   : > { %2214 = vmatpush1.bf16.xpose.msra.mxu0 %v4047_v41  ;;  %2255 = vmatpush1.bf16.xpose.msra.mxu1 %v4050_v42  ;;  %v4125_v41 = vld [vmem:[%s4783_s14 + $0x684] ss:$16 sps:$4 sm:$0xff]   ;;  %v4126_v42 = vld [vmem:[%s4783_s14 + $0x688] ss:$16 sps:$4 sm:$0xff]  }
 0x1de   : > { %2215 = vmatprep.subr.bf16.mxu0 %v4055_v43  ;;  %2256 = vmatprep.subr.bf16.mxu1 %v4058_v44  ;;  %v4131_v43 = vld [vmem:[%s4783_s14 + $0x664] ss:$16 sps:$4 sm:$0xff]   ;;  %v4134_v44 = vld [vmem:[%s4783_s14 + $0x66c] ss:$16 sps:$4 sm:$0xff]  }
 0x1e4   : > { %v1415_v49 = vpop.f32.mrf.mxu0  ;;  %v1456_v50 = vpop.f32.mrf.mxu1 }
 0x1e5   : > { %v1457_v52 = vadd.f32 %v1456_v50, %v1415_v49  ;;  %2216 = vmatpush2.bf16.xpose.msra.mxu0 %v4053_v45  ;;  %2257 = vmatpush2.bf16.xpose.msra.mxu1 %v4056_v46  ;;  %v4129_v45 = vld [vmem:[%s4783_s14 + $0x660] ss:$16 sps:$4 sm:$0xff]   ;;  %v4132_v46 = vld [vmem:[%s4783_s14 + $0x668] ss:$16 sps:$4 sm:$0xff]  }
 0x1e6   : > { %v1417_v53 = vpop.f32.mrf.mxu0  ;;  %v1458_v54 = vpop.f32.mrf.mxu1  ;;  %2217 = vmatprep.subr.bf16.mxu0 %v4061_v47  ;;  %2258 = vmatprep.subr.bf16.mxu1 %v4064_v48  ;;  %v4137_v47 = vld [vmem:[%s4783_s14 + $0x644] ss:$16 sps:$4 sm:$0xff]   ;;  %v4140_v48 = vld [vmem:[%s4783_s14 + $0x64c] ss:$16 sps:$4 sm:$0xff]   ;;  %v4135_v49 = vld [vmem:[%s4783_s14 + $0x640] ss:$16 sps:$4 sm:$0xff]  }
 0x1e7   : > { %v2371_v56 = vadd.f32 %v2363_v51, %v1457_v52  ;;  %v1459_v57 = vadd.f32 %v1458_v54, %v1417_v53  ;;  %v4138_v50 = vld [vmem:[%s4783_s14 + $0x648] ss:$16 sps:$4 sm:$0xff]   ;;  %v4143_v51 = vld [vmem:[%s4783_s14 + $0x624] ss:$16 sps:$4 sm:$0xff]   ;;  %v4146_v52 = vld [vmem:[%s4783_s14 + $0x62c] ss:$16 sps:$4 sm:$0xff]  }
 0x1e8   : > { %v1419_v58 = vpop.f32.mrf.mxu0  ;;  %v1460_v59 = vpop.f32.mrf.mxu1  ;;  %v4141_v53 = vld [vmem:[%s4783_s14 + $0x620] ss:$16 sps:$4 sm:$0xff]   ;;  %v4144_v54 = vld [vmem:[%s4783_s14 + $0x628] ss:$16 sps:$4 sm:$0xff]  }
 0x1e9   : > { %2379 = vst [vmem:[#allocation2 + $0x30] sm:$0xff] %v2371_v56  ;;  %v2372_v60 = vadd.f32 %v2364_v55, %v1459_v57  ;;  %v4149_v55 = vld [vmem:[%s4783_s14 + $0x604] ss:$16 sps:$4 sm:$0xff]   ;;  %v4152_v56 = vld [vmem:[%s4783_s14 + $0x60c] ss:$16 sps:$4 sm:$0xff]  }
 0x1ea   : > { %v1420_v63 = vpop.f32.mrf.mxu0  ;;  %v1461_v0 = vpop.f32.mrf.mxu1  ;;  %v4147_v57 = vld [vmem:[%s4783_s14 + $0x600] ss:$16 sps:$4 sm:$0xff]   ;;  %v4150_v58 = vld [vmem:[%s4783_s14 + $0x608] ss:$16 sps:$4 sm:$0xff]   ;;  %v4155_v59 = vld [vmem:[%s4783_s14 + $0x7e4] ss:$16 sps:$4 sm:$0xff]  }
 0x1eb   : > { %2380 = vst [vmem:[#allocation2] sm:$0xff] %v2372_v60  ;;  %v4158_v60 = vld [vmem:[%s4783_s14 + $0x7ec] ss:$16 sps:$4 sm:$0xff]   ;;  %v4161_v63 = vld [vmem:[%s4783_s14 + $0x7c4] ss:$16 sps:$4 sm:$0xff]  }
 0x1ec   : > { %v4164_v0 = vld [vmem:[%s4783_s14 + $0x7cc] ss:$16 sps:$4 sm:$0xff]  }
 0x1ed   : > { %2218 = vmatpush2.bf16.xpose.msra.mxu0 %v4059_v61  ;;  %2259 = vmatpush2.bf16.xpose.msra.mxu1 %v4062_v62  ;;  %v4153_v61 = vld [vmem:[%s4783_s14 + $0x7e0] ss:$16 sps:$4 sm:$0xff]   ;;  %v4156_v62 = vld [vmem:[%s4783_s14 + $0x7e8] ss:$16 sps:$4 sm:$0xff]  }
 0x1ee   : > { %2219 = vmatprep.subr.bf16.mxu0 %v4067_v1  ;;  %2260 = vmatprep.subr.bf16.mxu1 %v4070_v2 }
 0x1f5   : > { %2220 = vmatpush2.bf16.xpose.msra.mxu0 %v4065_v3  ;;  %2261 = vmatpush2.bf16.xpose.msra.mxu1 %v4068_v4  ;;  %v2365_v3 = vld [vmem:[#allocation2 + $0x18] sm:$0xff] }
 0x1f6   : > { %2221 = vmatprep.subr.bf16.mxu0 %v4073_v5  ;;  %2262 = vmatprep.subr.bf16.mxu1 %v4076_v6 }
 0x1fd   : > { %2222 = vmatpush2.bf16.xpose.msra.mxu0 %v4071_v7  ;;  %2263 = vmatpush2.bf16.xpose.msra.mxu1 %v4074_v10  ;;  %v2366_v7 = vld [vmem:[#allocation2 + $0x10] sm:$0xff] }
 0x1fe   : > { %2223 = vmatprep.subr.bf16.mxu0 %v4079_v13  ;;  %2264 = vmatprep.subr.bf16.mxu1 %v4082_v14 }
 0x205   : > { %2224 = vmatpush2.bf16.xpose.msra.mxu0 %v4077_v15  ;;  %2265 = vmatpush2.bf16.xpose.msra.mxu1 %v4080_v16 }
 0x206   : > { %2225 = vmatprep.subr.bf16.mxu0 %v4085_v19  ;;  %2266 = vmatprep.subr.bf16.mxu1 %v4088_v20  ;;  %v4159_v19 = vld [vmem:[%s4783_s14 + $0x7c0] ss:$16 sps:$4 sm:$0xff]   ;;  %v4162_v20 = vld [vmem:[%s4783_s14 + $0x7c8] ss:$16 sps:$4 sm:$0xff]  }
 0x20d   : > { %2226 = vmatpush2.bf16.xpose.msra.mxu0 %v4083_v21  ;;  %2267 = vmatpush2.bf16.xpose.msra.mxu1 %v4086_v8 }
 0x20e   : > { %2227 = vmatprep.subr.bf16.mxu0 %v4091_v9  ;;  %2268 = vmatprep.subr.bf16.mxu1 %v4094_v22  ;;  %v4167_v9 = vld [vmem:[%s4783_s14 + $0x7a4] ss:$16 sps:$4 sm:$0xff]   ;;  %v4170_v22 = vld [vmem:[%s4783_s14 + $0x7ac] ss:$16 sps:$4 sm:$0xff]  }
 0x215   : > { %2228 = vmatpush2.bf16.xpose.msra.mxu0 %v4089_v23  ;;  %2269 = vmatpush2.bf16.xpose.msra.mxu1 %v4092_v24  ;;  %v4165_v23 = vld [vmem:[%s4783_s14 + $0x7a0] ss:$16 sps:$4 sm:$0xff]   ;;  %v4168_v24 = vld [vmem:[%s4783_s14 + $0x7a8] ss:$16 sps:$4 sm:$0xff]  }
 0x216   : > { %2229 = vmatprep.subr.bf16.mxu0 %v4097_v25  ;;  %2270 = vmatprep.subr.bf16.mxu1 %v4100_v26  ;;  %v4173_v25 = vld [vmem:[%s4783_s14 + $0x784] ss:$16 sps:$4 sm:$0xff]   ;;  %v4176_v26 = vld [vmem:[%s4783_s14 + $0x78c] ss:$16 sps:$4 sm:$0xff]  }
 0x21d   : > { %2230 = vmatpush2.bf16.xpose.msra.mxu0 %v4095_v27  ;;  %2271 = vmatpush2.bf16.xpose.msra.mxu1 %v4098_v28  ;;  %v4171_v27 = vld [vmem:[%s4783_s14 + $0x780] ss:$16 sps:$4 sm:$0xff]   ;;  %v4174_v28 = vld [vmem:[%s4783_s14 + $0x788] ss:$16 sps:$4 sm:$0xff]  }
 0x21e   : > { %2281 = vmatprep.subr.bf16.mxu0 %v4107_v29  ;;  %2322 = vmatprep.subr.bf16.mxu1 %v4110_v30  ;;  %v4179_v29 = vld [vmem:[%s4783_s14 + $0x764] ss:$16 sps:$4 sm:$0xff]   ;;  %v4182_v30 = vld [vmem:[%s4783_s14 + $0x76c] ss:$16 sps:$4 sm:$0xff]  }
 0x224   : > { %2232 = vmatmul.mubr.bf16.vlgmr.msra.gmra.mxu0 %v5053_v31  ;;  %2273 = vmatmul.mubr.bf16.vlgmr.msra.gmra.mxu1 %v5057_v32 }
 0x225   : > { %2282 = vmatpush1.bf16.xpose.msra.mxu0 %v4105_v33  ;;  %2323 = vmatpush1.bf16.xpose.msra.mxu1 %v4108_v34  ;;  %v4177_v33 = vld [vmem:[%s4783_s14 + $0x760] ss:$16 sps:$4 sm:$0xff]   ;;  %v4180_v34 = vld [vmem:[%s4783_s14 + $0x768] ss:$16 sps:$4 sm:$0xff]  }
 0x226   : > { %2283 = vmatprep.subr.bf16.mxu0 %v4113_v35  ;;  %2324 = vmatprep.subr.bf16.mxu1 %v4116_v36  ;;  %v4185_v35 = vld [vmem:[%s4783_s14 + $0x744] ss:$16 sps:$4 sm:$0xff]   ;;  %v4188_v36 = vld [vmem:[%s4783_s14 + $0x74c] ss:$16 sps:$4 sm:$0xff]  }
 0x227   : > { %2313 = vmatprep.mubr.bf16.mxu0 %v4981_v17  ;;  %2354 = vmatprep.mubr.bf16.mxu1 %v4985_v18  ;;  %v4128_v17 = vld [vmem:[%s4783_s14 + $0x68c] ss:$16 sps:$4 sm:$0xff]   ;;  %v4123_v18 = vld [vmem:[%s4783_s14 + $0x680] ss:$16 sps:$4 sm:$0xff]  }
 0x22d   : > { %2284 = vmatpush1.bf16.xpose.msra.mxu0 %v4111_v11  ;;  %2325 = vmatpush1.bf16.xpose.msra.mxu1 %v4114_v12  ;;  %v4183_v11 = vld [vmem:[%s4783_s14 + $0x740] ss:$16 sps:$4 sm:$0xff]   ;;  %v4186_v12 = vld [vmem:[%s4783_s14 + $0x748] ss:$16 sps:$4 sm:$0xff]  }
 0x22e   : > { %2285 = vmatprep.subr.bf16.mxu0 %v4119_v37  ;;  %2326 = vmatprep.subr.bf16.mxu1 %v4122_v38  ;;  %v4191_v37 = vld [vmem:[%s4783_s14 + $0x724] ss:$16 sps:$4 sm:$0xff]   ;;  %v4194_v38 = vld [vmem:[%s4783_s14 + $0x72c] ss:$16 sps:$4 sm:$0xff]  }
 0x235   : > { %2286 = vmatpush1.bf16.xpose.msra.mxu0 %v4117_v39  ;;  %2327 = vmatpush1.bf16.xpose.msra.mxu1 %v4120_v40  ;;  %v4189_v39 = vld [vmem:[%s4783_s14 + $0x720] ss:$16 sps:$4 sm:$0xff]   ;;  %v4192_v40 = vld [vmem:[%s4783_s14 + $0x728] ss:$16 sps:$4 sm:$0xff]  }
 0x236   : > { %2287 = vmatprep.subr.bf16.mxu0 %v4125_v41  ;;  %2328 = vmatprep.subr.bf16.mxu1 %v4128_v17  ;;  %v4197_v41 = vld [vmem:[%s4783_s14 + $0x704] ss:$16 sps:$4 sm:$0xff]   ;;  %v4200_v17 = vld [vmem:[%s4783_s14 + $0x70c] ss:$16 sps:$4 sm:$0xff]  }
 0x23d   : > { %2288 = vmatpush1.bf16.xpose.msra.mxu0 %v4123_v18  ;;  %2329 = vmatpush1.bf16.xpose.msra.mxu1 %v4126_v42  ;;  %v4195_v18 = vld [vmem:[%s4783_s14 + $0x700] ss:$16 sps:$4 sm:$0xff]   ;;  %v4198_v42 = vld [vmem:[%s4783_s14 + $0x708] ss:$16 sps:$4 sm:$0xff]  }
 0x23e   : > { %2289 = vmatprep.subr.bf16.mxu0 %v4131_v43  ;;  %2330 = vmatprep.subr.bf16.mxu1 %v4134_v44 }
 0x245   : > { %2290 = vmatpush1.bf16.xpose.msra.mxu0 %v4129_v45  ;;  %2331 = vmatpush1.bf16.xpose.msra.mxu1 %v4132_v46  ;;  %v2367_v45 = vld [vmem:[#allocation2 + $0x8] sm:$0xff] }
 0x246   : > { %2291 = vmatprep.subr.bf16.mxu0 %v4137_v47  ;;  %2332 = vmatprep.subr.bf16.mxu1 %v4140_v48 }
 0x24d   : > { %2292 = vmatpush1.bf16.xpose.msra.mxu0 %v4135_v49  ;;  %2333 = vmatpush1.bf16.xpose.msra.mxu1 %v4138_v50  ;;  %v2368_v49 = vld [vmem:[#allocation2 + $0x20] sm:$0xff] }
 0x24e   : > { %2293 = vmatprep.subr.bf16.mxu0 %v4143_v51  ;;  %2334 = vmatprep.subr.bf16.mxu1 %v4146_v52 }
 0x255   : > { %2294 = vmatpush1.bf16.xpose.msra.mxu0 %v4141_v53  ;;  %2335 = vmatpush1.bf16.xpose.msra.mxu1 %v4144_v54 }
 0x256   : > { %2295 = vmatprep.subr.bf16.mxu0 %v4149_v55  ;;  %2336 = vmatprep.subr.bf16.mxu1 %v4152_v56 }
 0x25d   : > { %2296 = vmatpush1.bf16.xpose.msra.mxu0 %v4147_v57  ;;  %2337 = vmatpush1.bf16.xpose.msra.mxu1 %v4150_v58  ;;  %v2369_v58 = vld [vmem:[#allocation2 + $0x28] sm:$0xff] }
 0x25e   : > { %2297 = vmatprep.subr.bf16.mxu0 %v4155_v59  ;;  %2338 = vmatprep.subr.bf16.mxu1 %v4158_v60 }
 0x264   : > { %v1497_v1 = vpop.f32.mrf.mxu0  ;;  %v1538_v2 = vpop.f32.mrf.mxu1 }
 0x265   : > { %v1539_v4 = vadd.f32 %v1538_v2, %v1497_v1  ;;  %2298 = vmatpush2.bf16.xpose.msra.mxu0 %v4153_v61  ;;  %2339 = vmatpush2.bf16.xpose.msra.mxu1 %v4156_v62  ;;  %v2370_v61 = vld [vmem:[#allocation2 + $0x38] sm:$0xff] }
 0x266   : > { %v1499_v5 = vpop.f32.mrf.mxu0  ;;  %v1540_v6 = vpop.f32.mrf.mxu1  ;;  %2299 = vmatprep.subr.bf16.mxu0 %v4161_v63  ;;  %2340 = vmatprep.subr.bf16.mxu1 %v4164_v0 }
 0x267   : > { %v2373_v10 = vadd.f32 %v2365_v3, %v1539_v4  ;;  %v1541_v13 = vadd.f32 %v1540_v6, %v1499_v5 }
 0x268   : > { %v1501_v14 = vpop.f32.mrf.mxu0  ;;  %v1542_v15 = vpop.f32.mrf.mxu1 }
 0x269   : > { %2381 = vst [vmem:[#allocation2 + $0x18] sm:$0xff] %v2373_v10  ;;  %v2374_v16 = vadd.f32 %v2366_v7, %v1541_v13 }
 0x26a   : > { %v1502_v21 = vpop.f32.mrf.mxu0  ;;  %v1543_v8 = vpop.f32.mrf.mxu1 }
 0x26b   : > { %2382 = vst [vmem:[#allocation2 + $0x10] sm:$0xff] %v2374_v16 }
 0x26d   : > { %2300 = vmatpush2.bf16.xpose.msra.mxu0 %v4159_v19  ;;  %2341 = vmatpush2.bf16.xpose.msra.mxu1 %v4162_v20 }
 0x26e   : > { %2301 = vmatprep.subr.bf16.mxu0 %v4167_v9  ;;  %2342 = vmatprep.subr.bf16.mxu1 %v4170_v22 }
 0x275   : > { %2302 = vmatpush2.bf16.xpose.msra.mxu0 %v4165_v23  ;;  %2343 = vmatpush2.bf16.xpose.msra.mxu1 %v4168_v24 }
 0x276   : > { %2303 = vmatprep.subr.bf16.mxu0 %v4173_v25  ;;  %2344 = vmatprep.subr.bf16.mxu1 %v4176_v26 }
 0x27d   : > { %2304 = vmatpush2.bf16.xpose.msra.mxu0 %v4171_v27  ;;  %2345 = vmatpush2.bf16.xpose.msra.mxu1 %v4174_v28 }
 0x27e   : > { %2305 = vmatprep.subr.bf16.mxu0 %v4179_v29  ;;  %2346 = vmatprep.subr.bf16.mxu1 %v4182_v30 }
 0x285   : > { %2306 = vmatpush2.bf16.xpose.msra.mxu0 %v4177_v33  ;;  %2347 = vmatpush2.bf16.xpose.msra.mxu1 %v4180_v34 }
 0x286   : > { %2307 = vmatprep.subr.bf16.mxu0 %v4185_v35  ;;  %2348 = vmatprep.subr.bf16.mxu1 %v4188_v36 }
 0x28d   : > { %2308 = vmatpush2.bf16.xpose.msra.mxu0 %v4183_v11  ;;  %2349 = vmatpush2.bf16.xpose.msra.mxu1 %v4186_v12 }
 0x28e   : > { %2309 = vmatprep.subr.bf16.mxu0 %v4191_v37  ;;  %2350 = vmatprep.subr.bf16.mxu1 %v4194_v38 }
 0x295   : > { %2310 = vmatpush2.bf16.xpose.msra.mxu0 %v4189_v39  ;;  %2351 = vmatpush2.bf16.xpose.msra.mxu1 %v4192_v40 }
 0x296   : > { %2311 = vmatprep.subr.bf16.mxu0 %v4197_v41  ;;  %2352 = vmatprep.subr.bf16.mxu1 %v4200_v17 }
 0x29d   : > { %2312 = vmatpush2.bf16.xpose.msra.mxu0 %v4195_v18  ;;  %2353 = vmatpush2.bf16.xpose.msra.mxu1 %v4198_v42 }
 0x2a4   : > { %2314 = vmatmul.mubr.bf16.vlgmr.msra.gmra.mxu0 %v5053_v31  ;;  %2355 = vmatmul.mubr.bf16.vlgmr.msra.gmra.mxu1 %v5057_v32 }
 0x2e4   : > { %v2233_v43 = vpop.f32.mrf.mxu0  ;;  %v2274_v44 = vpop.f32.mrf.mxu1 }
 0x2e5   : > { %v2275_v46 = vadd.f32 %v2274_v44, %v2233_v43 }
 0x2e6   : > { %v2235_v47 = vpop.f32.mrf.mxu0  ;;  %v2276_v48 = vpop.f32.mrf.mxu1 }
 0x2e7   : > { %v2375_v50 = vadd.f32 %v2367_v45, %v2275_v46  ;;  %v2277_v51 = vadd.f32 %v2276_v48, %v2235_v47 }
 0x2e8   : > { %v2237_v52 = vpop.f32.mrf.mxu0  ;;  %v2278_v53 = vpop.f32.mrf.mxu1 }
 0x2e9   : > { %2383 = vst [vmem:[#allocation2 + $0x8] sm:$0xff] %v2375_v50  ;;  %v2376_v54 = vadd.f32 %v2368_v49, %v2277_v51 }
 0x2ea   : > { %v2238_v55 = vpop.f32.mrf.mxu0  ;;  %v2279_v56 = vpop.f32.mrf.mxu1 }
 0x2eb   : > { %2384 = vst [vmem:[#allocation2 + $0x20] sm:$0xff] %v2376_v54 }
 0x364   : > { %v2315_v57 = vpop.f32.mrf.mxu0  ;;  %v2356_v31 = vpop.f32.mrf.mxu1 }
 0x365   : > { %v2357_v32 = vadd.f32 %v2356_v31, %v2315_v57 }
 0x366   : > { %v2317_v59 = vpop.f32.mrf.mxu0  ;;  %v2358_v60 = vpop.f32.mrf.mxu1 }
 0x367   : > { %v2377_v62 = vadd.f32 %v2369_v58, %v2357_v32  ;;  %v2359_v63 = vadd.f32 %v2358_v60, %v2317_v59  ;;  %2390 = sbr.rel (%p3581_p3) target bundleno = 1175 (0x497), region = 68 }
 0x368   : > { %v2319_v0 = vpop.f32.mrf.mxu0  ;;  %v2360_v1 = vpop.f32.mrf.mxu1 }
 0x369   : > { %2385 = vst [vmem:[#allocation2 + $0x28] sm:$0xff] %v2377_v62  ;;  %v2378_v2 = vadd.f32 %v2370_v61, %v2359_v63 }
 0x36a   : > { %v2320_v3 = vpop.f32.mrf.mxu0  ;;  %v2361_v4 = vpop.f32.mrf.mxu1 }
 0x36b   : > { %2386 = vst [vmem:[#allocation2 + $0x38] sm:$0xff] %v2378_v2 }
 0x36c   : > { %v4201_v5 = vld [vmem:[%s4808_s13 + $0x78] sm:$0xff]   ;;  %v4205_v13 = vld [vmem:[%s4808_s13 + $0x70] sm:$0xff]   ;;  %v4209_v19 = vld [vmem:[%s4808_s13 + $0x68] sm:$0xff]   ;;  %v2420_v18 = vlaneseq  ;;  %vm2454_vm0 = vcmask 1041409   ;;  %vm2476_vm1 = vcmask 1041408   ;;  %vm2456_vm2 = vcmask 1043459  }
 0x36d   : > { %v4202_v6 = vld [vmem:[%s4808_s13 + $0xf8] sm:$0xff]   ;;  %3626 = vmatprep.subr.bf16.mxu0 %v4201_v5  ;;  %v4206_v14 = vld [vmem:[%s4808_s13 + $0xf0] sm:$0xff]   ;;  %v4210_v20 = vld [vmem:[%s4808_s13 + $0xe8] sm:$0xff]   ;;  %v4525_v54 = vmov 1983009808   ;;  %vm2458_vm3 = vcmask 1045509  }
 0x36e   : > { %v4203_v7 = vld [vmem:[%s4808_s13 + $0x38] sm:$0xff]   ;;  %3648 = vmatprep.subr.bf16.mxu1 %v4202_v6  ;;  %v4207_v15 = vld [vmem:[%s4808_s13 + $0x30] sm:$0xff]   ;;  %v4211_v21 = vld [vmem:[%s4808_s13 + $0x28] sm:$0xff]   ;;  %v2418_v55 = vunpack.c.l.s4 %v4525_v54  ;;  %v5173_v57 = vshrl.u32 %v2420_v18, 7  ;;  %vm2460_vm4 = vcmask 1047559  }
 0x36f   : > { %v4204_v10 = vld [vmem:[%s4808_s13 + $0xb8] sm:$0xff]   ;;  %3627 = vmatpush3.bf16.msra.mxu0 %v4203_v7  ;;  %v4208_v16 = vld [vmem:[%s4808_s13 + $0xb0] sm:$0xff]   ;;  %v4212_v8 = vld [vmem:[%s4808_s13 + $0xa8] sm:$0xff]  }
 0x370   : > { %3649 = vmatpush3.bf16.msra.mxu1 %v4204_v10  ;;  %3628 = vmatprep.subr.bf16.mxu0 %v4205_v13  ;;  %v4213_v9 = vld [vmem:[%s4808_s13 + $0x60] sm:$0xff]   ;;  %v4217_v25 = vld [vmem:[%s4808_s13 + $0x58] sm:$0xff]   ;;  %v4221_v29 = vld [vmem:[%s4808_s13 + $0x50] sm:$0xff]   ;;  %v2419_v60 = vunpack.c.0.s8 %v2418_v55 }
 0x371   : > { %3650 = vmatprep.subr.bf16.mxu1 %v4206_v14  ;;  %v4214_v22 = vld [vmem:[%s4808_s13 + $0xe0] sm:$0xff]   ;;  %v4218_v26 = vld [vmem:[%s4808_s13 + $0xd8] sm:$0xff]   ;;  %v4222_v30 = vld [vmem:[%s4808_s13 + $0xd0] sm:$0xff]  }
 0x372   : > { %v4215_v23 = vld [vmem:[%s4808_s13 + $0x20] sm:$0xff]   ;;  %v4219_v27 = vld [vmem:[%s4808_s13 + $0x18] sm:$0xff]   ;;  %v4223_v33 = vld [vmem:[%s4808_s13 + $0x10] sm:$0xff]   ;;  %v2422_v4 = vsub.s32 %v2419_v60, %v5173_v57 }
 0x373   : > { %3629 = vmatpush3.bf16.msra.mxu0 %v4207_v15  ;;  %v4216_v24 = vld [vmem:[%s4808_s13 + $0xa0] sm:$0xff]   ;;  %v4220_v28 = vld [vmem:[%s4808_s13 + $0x98] sm:$0xff]   ;;  %v4224_v34 = vld [vmem:[%s4808_s13 + $0x90] sm:$0xff]  }
 0x374   : > { %3651 = vmatpush3.bf16.msra.mxu1 %v4208_v16  ;;  %3630 = vmatprep.subr.bf16.mxu0 %v4209_v19  ;;  %v4225_v35 = vld [vmem:[%s4808_s13 + $0x48] sm:$0xff]   ;;  %v4229_v37 = vld [vmem:[%s4808_s13 + $0x40] sm:$0xff]   ;;  %v2392_v41 = vld [vmem:[#allocation2] sm:$0xff] }
 0x375   : > { %3652 = vmatprep.subr.bf16.mxu1 %v4210_v20  ;;  %v4226_v36 = vld [vmem:[%s4808_s13 + $0xc8] sm:$0xff]   ;;  %v4230_v38 = vld [vmem:[%s4808_s13 + $0xc0] sm:$0xff]   ;;  %v2396_v17 = vld [vmem:[#allocation2 + $0x20] sm:$0xff]  ;;  %v5160_v42 = vmul.f32 0.0009765625, %v2392_v41 }
 0x376   : > { %v4227_v11 = vld [vmem:[%s4808_s13 + $0x8] sm:$0xff]   ;;  %v4231_v39 = vld [vmem:[%s4808_s13] sm:$0xff]   ;;  %v5162_v43 = vmul.f32 0.0009765625, %v2396_v17  ;;  %v2395_v49 = vld [vmem:[#allocation2 + $0x8] sm:$0xff] }
 0x377   : > { %3631 = vmatpush3.bf16.msra.mxu0 %v4211_v21  ;;  %v4228_v12 = vld [vmem:[%s4808_s13 + $0x88] sm:$0xff]   ;;  %v4232_v40 = vld [vmem:[%s4808_s13 + $0x80] sm:$0xff]   ;;  %v5171_v53 = vmul.f32 0.0009765625, %v2395_v49  ;;  %v2397_v56 = vld [vmem:[#allocation2 + $0x28] sm:$0xff] }
 0x378   : > { %3653 = vmatpush3.bf16.msra.mxu1 %v4212_v8  ;;  %3632 = vmatprep.subr.bf16.mxu0 %v4213_v9  ;;  %v2394_v44 = vld [vmem:[#allocation2 + $0x10] sm:$0xff]  ;;  %v2398_v45 = vld [vmem:[#allocation2 + $0x38] sm:$0xff]  ;;  %v2466_v51 = vrot.slane %v5162_v43, 7  ;;  %v5188_v1 = vmul.f32 0.0009765625, %v2397_v56 }
 0x379   : > { %3654 = vmatprep.subr.bf16.mxu1 %v4214_v22  ;;  %v5164_v46 = vmul.f32 0.0009765625, %v2394_v44  ;;  %v5166_v47 = vmul.f32 0.0009765625, %v2398_v45  ;;  %v2391_v48 = vld [vmem:[#allocation2 + $0x30] sm:$0xff]  ;;  %v2393_v50 = vld [vmem:[#allocation2 + $0x18] sm:$0xff]  ;;  %v2432_v61 = vcombine.low %v5171_v53, %v5162_v43  ;;  %v2464_v0 = vrot.slane %v5171_v53, 7 }
 0x37a   : > { %v5169_v52 = vmul.f32 0.0009765625, %v2391_v48  ;;  %v5176_v58 = vmul.f32 0.0009765625, %v2393_v50  ;;  %v2467_v32 = vsel %vm2454_vm0, %v2466_v51, %v5160_v42  ;;  %v2468_v13 = vrot.slane %v5188_v1, 7 }
 0x37b   : > { %3633 = vmatpush3.bf16.msra.mxu0 %v4215_v23  ;;  %v2470_v31 = vrot.slane %v5166_v47, 7  ;;  %v2484_v62 = vsel %vm2476_vm1, %v2467_v32, 0.0  ;;  %v2433_v10 = vcombine.low %v5188_v1, %v5166_v47  ;;  %v2440_v16 = vrot.slane %v2432_v61, %v2422_v4 }
 0x37c   : > { %3655 = vmatpush3.bf16.msra.mxu1 %v4216_v24  ;;  %3634 = vmatprep.subr.bf16.mxu0 %v4217_v25  ;;  %v2415_v59 = vcombine.low %v5169_v52, %v5160_v42  ;;  %v2485_v2 = vrot.slane %v2484_v62, 4  ;;  %v2416_v5 = vcombine.low %v5176_v58, %v5164_v46  ;;  %v2465_v7 = vsel %vm2454_vm0, %v2464_v0, %v5169_v52 }
 0x37d   : > { %3656 = vmatprep.subr.bf16.mxu1 %v4218_v26  ;;  %v2471_v63 = vsel %vm2454_vm0, %v2470_v31, %v5164_v46  ;;  %v2477_v19 = vsel %vm2476_vm1, %v2465_v7, 0.0  ;;  %v2447_v9 = vrot.slane %v2433_v10, %v2422_v4  ;;  %v2469_v23 = vsel %vm2454_vm0, %v2468_v13, %v5176_v58 }
 0x37e   : > { %v2498_v3 = vsel %vm2476_vm1, %v2471_v63, 0.0  ;;  %v2486_v14 = vadd.f32 %v2485_v2, %v2484_v62  ;;  %v2423_v15 = vrot.slane %v2415_v59, %v2422_v4  ;;  %v2478_v21 = vrot.slane %v2477_v19, 4 }
 0x37f   : > { %3635 = vmatpush3.bf16.msra.mxu0 %v4219_v27  ;;  %v2499_v6 = vrot.slane %v2498_v3, 4  ;;  %v2430_v8 = vrot.slane %v2416_v5, %v2422_v4  ;;  %v2448_v27 = vcombine.low %v2440_v16, %v2447_v9 }
 0x380   : > { %3657 = vmatpush3.bf16.msra.mxu1 %v4220_v28  ;;  %3636 = vmatprep.subr.bf16.mxu0 %v4221_v29  ;;  %v2487_v22 = vrot.slane %v2486_v14, 2  ;;  %v2479_v25 = vadd.f32 %v2478_v21, %v2477_v19  ;;  %v2491_v29 = vsel %vm2476_vm1, %v2469_v23, 0.0 }
 0x381   : > { %3658 = vmatprep.subr.bf16.mxu1 %v4222_v30  ;;  %v2500_v20 = vadd.f32 %v2499_v6, %v2498_v3  ;;  %v2431_v26 = vcombine.low %v2423_v15, %v2430_v8 }
 0x382   : > { %v2488_v28 = vadd.f32 %v2487_v22, %v2486_v14 }
 0x383   : > { %3637 = vmatpush3.bf16.msra.mxu0 %v4223_v33  ;;  %v2501_v24 = vrot.slane %v2500_v20, 2  ;;  %v2480_v33 = vrot.slane %v2479_v25, 2 }
 0x384   : > { %3659 = vmatpush3.bf16.msra.mxu1 %v4224_v34  ;;  %3638 = vmatprep.subr.bf16.mxu0 %v4225_v35  ;;  %v2453_v34 = vrot.slane %v2448_v27, 7  ;;  %v2492_v35 = vrot.slane %v2491_v29, 4 }
 0x385   : > { %3660 = vmatprep.subr.bf16.mxu1 %v4226_v36  ;;  %v2502_v30 = vadd.f32 %v2501_v24, %v2500_v20  ;;  %v2489_v36 = vrot.slane %v2488_v28, 1 }
 0x387   : > { %3639 = vmatpush3.bf16.msra.mxu0 %v4227_v11  ;;  %v2503_v11 = vrot.slane %v2502_v30, 1 }
 0x388   : > { %3661 = vmatpush3.bf16.msra.mxu1 %v4228_v12  ;;  %3640 = vmatprep.subr.bf16.mxu0 %v4229_v37  ;;  %v2481_v12 = vadd.f32 %v2480_v33, %v2479_v25  ;;  %v2455_v37 = vsel %vm2454_vm0, %v2453_v34, %v2431_v26 }
 0x389   : > { %3662 = vmatprep.subr.bf16.mxu1 %v4230_v38  ;;  %v2493_v38 = vadd.f32 %v2492_v35, %v2491_v29  ;;  %v2457_v41 = vsel %vm2456_vm2, %v2453_v34, %v2455_v37  ;;  %v2504_v17 = vadd.f32 %v2503_v11, %v2502_v30 }
 0x38a   : > { %v2482_v18 = vrot.slane %v2481_v12, 1  ;;  %v2459_v44 = vsel %vm2458_vm3, %v2453_v34, %v2457_v41 }
 0x38b   : > { %3641 = vmatpush3.bf16.msra.mxu0 %v4231_v39  ;;  %v2490_v39 = vadd.f32 %v2489_v36, %v2488_v28  ;;  %v2494_v45 = vrot.slane %v2493_v38, 2  ;;  %v2461_v49 = vsel %vm2460_vm4, %v2453_v34, %v2459_v44  ;;  %v2509_v50 = vmul.f32 0.5, %v2504_v17 }
 0x38c   : > { %3663 = vmatpush3.bf16.msra.mxu1 %v4232_v40  ;;  %v5205_v40 = vsub.s32 0, %v5173_v57  ;;  %v2483_v51 = vadd.f32 %v2482_v18, %v2481_v12  ;;  %2463 = vst [vmem:[%s4812_s15] sm:$0xff] %v2461_v49 }
 0x38d   : > { %v2507_v48 = vmul.f32 0.5, %v2490_v39  ;;  %v2495_v54 = vadd.f32 %v2494_v45, %v2493_v38 }
 0x38e   : > { %v2525_v56 = vrot.slane %v2509_v50, %v5205_v40  ;;  %v2506_v31 = vmul.f32 0.5, %v2483_v51 }
 0x38f   : > { %v2517_v55 = vrot.slane %v2507_v48, %v5205_v40  ;;  %v2496_v32 = vrot.slane %v2495_v54, 1 }
 0x390   : > { %v5217_v61 = vsub.f32 %v5164_v46, %v2525_v56  ;;  %v5220_v62 = vsub.f32 %v5166_v47, %v2525_v56  ;;  %v2513_v63 = vrot.slane %v2506_v31, %v5205_v40 }
 0x391   : > { %v5211_v59 = vsub.f32 %v5160_v42, %v2517_v55  ;;  %v5214_v60 = vsub.f32 %v5162_v43, %v2517_v55  ;;  %v2497_v0 = vadd.f32 %v2496_v32, %v2495_v54 }
 0x392   : > { %v2537_v42 = vmul.f32 %v5217_v61, %v5217_v61  ;;  %v2541_v43 = vmul.f32 %v5220_v62, %v5220_v62  ;;  %v5232_v46 = vsub.f32 %v5169_v52, %v2513_v63  ;;  %v5235_v47 = vsub.f32 %v5171_v53, %v2513_v63 }
 0x393   : > { %v2535_v2 = vmul.f32 %v5211_v59, %v5211_v59  ;;  %v2539_v3 = vmul.f32 %v5214_v60, %v5214_v60  ;;  %v2508_v5 = vmul.f32 0.5, %v2497_v0 }
 0x394   : > { %v2556_v6 = vrot.slane %v2541_v43, 7  ;;  %v2534_v7 = vmul.f32 %v5232_v46, %v5232_v46  ;;  %v2538_v10 = vmul.f32 %v5235_v47, %v5235_v47 }
 0x395   : > { %v2552_v4 = vrot.slane %v2539_v3, 7  ;;  %v2521_v14 = vrot.slane %v2508_v5, %v5205_v40  ;;  %v2626_v3 = vld [vmem:[%s4793_s19] sm:$0xf] }
 0x396   : > { %v2557_v52 = vsel %vm2454_vm0, %v2556_v6, %v2537_v42  ;;  %v2550_v16 = vrot.slane %v2538_v10, 7  ;;  %v2642_v42 = vsub.s32 3, %v5173_v57 }
 0x397   : > { %v2553_v13 = vsel %vm2454_vm0, %v2552_v4, %v2535_v2  ;;  %v2583_v19 = vsel %vm2476_vm1, %v2557_v52, 0.0  ;;  %v5247_v20 = vsub.f32 %v5176_v58, %v2521_v14  ;;  %v5250_v21 = vsub.f32 %v5188_v1, %v2521_v14  ;;  %v2656_v4 = vld [vmem:[%s4799_s12] sm:$0xf] }
 0x398   : > { %v2569_v15 = vsel %vm2476_vm1, %v2553_v13, 0.0  ;;  %v2584_v8 = vrot.slane %v2583_v19, 4  ;;  %v2551_v9 = vsel %vm2454_vm0, %v2550_v16, %v2534_v7  ;;  %v2634_v2 = vsub.s32 1, %v5173_v57 }
 0x399   : > { %v2570_v53 = vrot.slane %v2569_v15, 4  ;;  %v2562_v23 = vsel %vm2476_vm1, %v2551_v9, 0.0  ;;  %v2536_v24 = vmul.f32 %v5247_v20, %v5247_v20  ;;  %v2540_v25 = vmul.f32 %v5250_v21, %v5250_v21 }
 0x39a   : > { %v2585_v26 = vadd.f32 %v2584_v8, %v2583_v19  ;;  %v2563_v27 = vrot.slane %v2562_v23, 4  ;;  %v2635_v7 = vrot.slane %v2626_v3, %v2634_v2  ;;  %v2643_v13 = vrot.slane %v2626_v3, %v2642_v42 }
 0x39b   : > { %v2571_v22 = vadd.f32 %v2570_v53, %v2569_v15  ;;  %v2554_v58 = vrot.slane %v2540_v25, 7  ;;  %v2638_v14 = vsub.s32 2, %v5173_v57  ;;  %v2665_v53 = vrot.slane %v2656_v4, %v2634_v2 }
 0x39c   : > { %v2586_v29 = vrot.slane %v2585_v26, 2  ;;  %v2564_v30 = vadd.f32 %v2563_v27, %v2562_v23  ;;  %v2673_v19 = vrot.slane %v2656_v4, %v2642_v42  ;;  %v2631_v23 = vrot.slane %v2626_v3, %v5205_v40 }
 0x39d   : > { %v2572_v28 = vrot.slane %v2571_v22, 2  ;;  %v2555_v33 = vsel %vm2454_vm0, %v2554_v58, %v2536_v24 }
 0x39e   : > { %v2587_v34 = vadd.f32 %v2586_v29, %v2585_v26  ;;  %v2565_v35 = vrot.slane %v2564_v30, 2  ;;  %v2576_v36 = vsel %vm2476_vm1, %v2555_v33, 0.0  ;;  %v2661_v26 = vrot.slane %v2656_v4, %v5205_v40 }
 0x39f   : > { %v2573_v1 = vadd.f32 %v2572_v28, %v2571_v22  ;;  %v2577_v12 = vrot.slane %v2576_v36, 4  ;;  %v2639_v29 = vrot.slane %v2626_v3, %v2638_v14 }
 0x3a0   : > { %v2588_v37 = vrot.slane %v2587_v34, 1  ;;  %v2566_v38 = vadd.f32 %v2565_v35, %v2564_v30 }
 0x3a1   : > { %v2574_v11 = vrot.slane %v2573_v1, 1  ;;  %v2578_v41 = vadd.f32 %v2577_v12, %v2576_v36 }
 0x3a2   : > { %v2589_v17 = vadd.f32 %v2588_v37, %v2587_v34  ;;  %v2567_v18 = vrot.slane %v2566_v38, 1 }
 0x3a3   : > { %v2575_v39 = vadd.f32 %v2574_v11, %v2573_v1  ;;  %v2579_v45 = vrot.slane %v2578_v41, 2  ;;  %v2669_v11 = vrot.slane %v2656_v4, %v2638_v14 }
 0x3a4   : > { %v2593_v48 = vmul.f32 0.5, %v2589_v17  ;;  %v2568_v49 = vadd.f32 %v2567_v18, %v2566_v38 }
 0x3a5   : > { %v2591_v44 = vmul.f32 0.5, %v2575_v39  ;;  %v2580_v51 = vadd.f32 %v2579_v45, %v2578_v41 }
 0x3a6   : > { %v2597_v54 = vadd.f32 1e-05, %v2593_v48  ;;  %v2590_v55 = vmul.f32 0.5, %v2568_v49 }
 0x3a7   : > { %v2595_v50 = vadd.f32 1e-05, %v2591_v44  ;;  %v2581_v56 = vrot.slane %v2580_v51, 1 }
 0x3a8   : > { %v2594_v31 = vadd.f32 1e-05, %v2590_v55 }
 0x3a9   : > { %4233 = vrsqrt.f32 %v2595_v50  ;;  %v2582_v32 = vadd.f32 %v2581_v56, %v2580_v51 }
 0x3aa   : > { %4235 = vrsqrt.f32 %v2597_v54 }
 0x3ab   : > { %4237 = vrsqrt.f32 %v2594_v31  ;;  %v2592_v63 = vmul.f32 0.5, %v2582_v32 }
 0x3ad   : > { %v2596_v0 = vadd.f32 1e-05, %v2592_v63 }
 0x3af   : > { %4239 = vrsqrt.f32 %v2596_v0 }
 0x3b6   : > { %v4234_v43 = vpop.eup %4233 }
 0x3b7   : > { %v4236_v5 = vpop.eup %4235  ;;  %v2609_v6 = vrot.slane %v4234_v43, %v5205_v40 }
 0x3b8   : > { %v2617_v10 = vrot.slane %v4236_v5, %v5205_v40  ;;  %v4238_v15 = vpop.eup %4237 }
 0x3b9   : > { %v2619_v52 = vmul.f32 %v2609_v6, %v5211_v59  ;;  %v2623_v16 = vmul.f32 %v2609_v6, %v5214_v60  ;;  %v2605_v22 = vrot.slane %v4238_v15, %v5205_v40 }
 0x3ba   : > { %v2621_v8 = vmul.f32 %v2617_v10, %v5217_v61  ;;  %v2625_v9 = vmul.f32 %v2617_v10, %v5220_v62 }
 0x3bb   : > { %v2649_v24 = vmul.f32 %v2635_v7, %v2619_v52  ;;  %v2653_v25 = vmul.f32 %v2635_v7, %v2623_v16  ;;  %v2618_v59 = vmul.f32 %v2605_v22, %v5232_v46  ;;  %v2622_v60 = vmul.f32 %v2605_v22, %v5235_v47 }
 0x3bc   : > { %v2651_v57 = vmul.f32 %v2643_v13, %v2621_v8  ;;  %v2655_v27 = vmul.f32 %v2643_v13, %v2625_v9  ;;  %v4240_v61 = vpop.eup %4239 }
 0x3bd   : > { %v2679_v28 = vadd.f32 %v2665_v53, %v2649_v24  ;;  %v2683_v58 = vadd.f32 %v2665_v53, %v2653_v25  ;;  %v2648_v1 = vmul.f32 %v2631_v23, %v2618_v59  ;;  %v2652_v33 = vmul.f32 %v2631_v23, %v2622_v60 }
 0x3be   : > { %v2681_v30 = vadd.f32 %v2673_v19, %v2651_v57  ;;  %v2685_v62 = vadd.f32 %v2673_v19, %v2655_v27  ;;  %v2613_v36 = vrot.slane %v4240_v61, %v5205_v40 }
 0x3bf   : > { %v2687_v34 = vpack.c.bf16 %v2679_v28, %v2679_v28  ;;  %v2691_v35 = vpack.c.bf16 %v2683_v58, %v2683_v58  ;;  %v2678_v38 = vadd.f32 %v2661_v26, %v2648_v1  ;;  %v2682_v39 = vadd.f32 %v2661_v26, %v2652_v33 }
 0x3c0   : > { %v2689_v12 = vpack.c.bf16 %v2681_v30, %v2681_v30  ;;  %v2693_v37 = vpack.c.bf16 %v2685_v62, %v2685_v62  ;;  %v2620_v47 = vmul.f32 %v2613_v36, %v5247_v20  ;;  %v2624_v17 = vmul.f32 %v2613_v36, %v5250_v21 }
 0x3c1   : > { %v2767_v46 = vunpack.c.l.b16 %v2687_v34  ;;  %v2771_v41 = vunpack.c.l.b16 %v2691_v35  ;;  %v2686_v45 = vpack.c.bf16 %v2678_v38, %v2678_v38  ;;  %v2690_v48 = vpack.c.bf16 %v2682_v39, %v2682_v39 }
 0x3c2   : > { %v2769_v18 = vunpack.c.l.b16 %v2689_v12  ;;  %v2773_v44 = vunpack.c.l.b16 %v2693_v37  ;;  %v2650_v50 = vmul.f32 %v2639_v29, %v2620_v47  ;;  %v2654_v51 = vmul.f32 %v2639_v29, %v2624_v17 }
 0x3c3   : > { %v2776_v49 = vrot.slane %v2771_v41, 7  ;;  %v2766_v40 = vunpack.c.l.b16 %v2686_v45  ;;  %v2770_v55 = vunpack.c.l.b16 %v2690_v48 }
 0x3c4   : > { %v2780_v54 = vrot.slane %v2773_v44, 7  ;;  %v2680_v31 = vadd.f32 %v2669_v11, %v2650_v50  ;;  %v2684_v32 = vadd.f32 %v2669_v11, %v2654_v51 }
 0x3c5   : > { %v2777_v56 = vsel %vm2454_vm0, %v2776_v49, %v2767_v46  ;;  %v2774_v20 = vrot.slane %v2770_v55, 7 }
 0x3c6   : > { %v2783_v63 = vpack.c.b16 %v2777_v56, %v2777_v56  ;;  %v2781_v0 = vsel %vm2454_vm0, %v2780_v54, %v2769_v18  ;;  %v2688_v21 = vpack.c.bf16 %v2680_v31, %v2680_v31  ;;  %v2692_v3 = vpack.c.bf16 %v2684_v32, %v2684_v32 }
 0x3c7   : > { %v2785_v2 = vpack.c.b16 %v2781_v0, %v2781_v0  ;;  %v2775_v42 = vsel %vm2454_vm0, %v2774_v20, %v2766_v40 }
 0x3c8   : > { %3014 = vmatprep.mubr.bf16.mxu0 %v2783_v63  ;;  %v2782_v43 = vpack.c.b16 %v2775_v42, %v2775_v42  ;;  %v2768_v4 = vunpack.c.l.b16 %v2688_v21  ;;  %v2772_v5 = vunpack.c.l.b16 %v2692_v3 }
 0x3c9   : > { %3054 = vmatprep.mubr.bf16.mxu1 %v2785_v2 }
 0x3ca   : > { %3015 = vmatmul.mubr.bf16.vlgmr.msra.gmra.mxu0 %v2782_v43  ;;  %v2778_v6 = vrot.slane %v2772_v5, 7 }
 0x3cc   : > { %v2779_v7 = vsel %vm2454_vm0, %v2778_v6, %v2768_v4 }
 0x3cd   : > { %v2784_v10 = vpack.c.b16 %v2779_v7, %v2779_v7 }
 0x3cf   : > { %3055 = vmatmul.mubr.bf16.vlgmr.msra.gmra.mxu1 %v2784_v10 }
 0x48a   : > { %v3642_v13 = vpop.f32.mrf.mxu0 }
 0x48c   : > { %v3643_v14 = vpop.f32.mrf.mxu0 }
 0x48d   : > { %v3644_v16 = vadd.f32 %v3643_v14, %v3642_v13 }
 0x48e   : > { %v3645_v15 = vpop.f32.mrf.mxu0 }
 0x48f   : > { %v3664_v52 = vpop.f32.mrf.mxu1 }
 0x490   : > { %v3646_v53 = vpop.f32.mrf.mxu0 }
 0x491   : > { %v3665_v19 = vpop.f32.mrf.mxu1 }
 0x492   : > { %v3666_v8 = vadd.f32 %v3665_v19, %v3664_v52 }
 0x493   : > { %v3667_v9 = vpop.f32.mrf.mxu1 }
 0x494   : > { %v3057_v22 = vadd.f32 %v3666_v8, %v3644_v16 }
 0x495   : > { %v3668_v23 = vpop.f32.mrf.mxu1 }
 0x496   : > { %3062 = vst [vmem:[%s4810_s1] sm:$0x3] %v3057_v22 }
 0x497 PF: > { %s5414_s27 = sld [smem:[#allocation27_spill]]  ;;  %s3082_s21 = sshll.u32 %s4810_s1, 4  ;;  %s3083_s21 = int_to_ptr.vmem [resolvable:$true] %s3082_s21 }
 0x498   : > { %s5415_s10 = sld [smem:[#allocation33_spill]]  ;;  %s3064_s29 = scalar_lea.sflag [#allocation5], %s4790_s3 }
 0x499   : > { %s5416_s17 = sld [smem:[#allocation38_spill]]  ;;  %s4345_s20 = scalar_lea.vmem %s3083_s21, 32 }
 0x49a   : > { %p4346_p7 = scmp.ne.s32.totalorder %s3083_s21, %s4345_s20  ;;  %s4526_s0 = smov [#allocation12]  }
 0x49b   : > { %s4349_s26 = sshll.u32 %s4526_s0, 4  ;;  %s4350_s26 = int_to_ptr.vmem [resolvable:$false] %s4349_s26 }
 0x49c   : > { %s4351_s9 = scalar_lea.vmem %s4350_s26, 64  ;;  %p4352_p10 = scmp.lt.s32.totalorder %s3083_s21, %s4350_s26 }
 0x49d   : > { %s3616_s18 = sshll.u32 %s5414_s27, 5  ;;  %p4353_p8 = scmp.lt.s32.totalorder %s4351_s9, %s4345_s20 }
 0x49e   : > { %p5417_p12 = scmp.ne.s32.totalorder %s5415_s10, 0 }
 0x49f   : > { %s3080_s23 = scalar_lea.hbm %s5416_s17, %s3616_s18  ;;  %p4354_p0 = por %p4353_p8, %p4352_p10 }
 0x4a0   : > { %p4347_p13 = pnand %p4346_p7, %p5417_p12 }
 0x4a2   : > { %p4348_p5 = pneg %p4347_p13 }
 0x4a4   : > { %p4355_p9 = pnand %p4354_p0, %p4348_p5 }
 0x4a6   : > { %4358 = shalt.err (!%p4355_p9)
}
 0x4a7   : > { %s4359_s14 = scalar_lea.hbm %s3080_s23, 32  ;;  %s4363_s8 = scalar_lea.hbm %s5416_s17, 64 }
 0x4a8   : > { %p4360_p1 = scmp.ne.s32.totalorder %s3080_s23, %s4359_s14  ;;  %p4364_p11 = scmp.lt.s32.totalorder %s3080_s23, %s5416_s17 }
 0x4a9   : > { %p4365_p2 = scmp.lt.s32.totalorder %s4363_s8, %s4359_s14 }
 0x4aa   : > { %p4361_p4 = pnand %p4360_p1, %p5417_p12 }
 0x4ab   : > { %p4366_p3 = por %p4365_p2, %p4364_p11 }
 0x4ac   : > { %p4362_p6 = pneg %p4361_p4 }
 0x4ae   : > { %p4367_p7 = pnand %p4366_p3, %p4362_p6 }
 0x4b0   : > { %4370 = shalt.err (!%p4367_p7)
}
 0x4b1   : > { %3689 = dma.vmem_to_hbm [thread:$0]  (%p5417_p12), %s3083_s21, 32, %s3080_s23, %s3064_s29  }
 0x4b2   : > { %s3625_s24 = sshll.u32 %s5414_s27, 7  ;;  %s3096_s11 = sshll.u32 %s4812_s15, 4  ;;  %s3097_s11 = int_to_ptr.vmem [resolvable:$true] %s3096_s11 }
 0x4b3   : > { %s5418_s18 = sld [smem:[#allocation39_spill]]  ;;  %s3069_s6 = scalar_lea.sflag [#allocation14], %s4790_s3 }
 0x4b4   : > { %s4371_s20 = scalar_lea.vmem %s3097_s11, 128  ;;  %s4527_s0 = smov [#allocation13]  }
 0x4b5   : > { %p4372_p13 = scmp.ne.s32.totalorder %s3097_s11, %s4371_s20  ;;  %s4375_s26 = sshll.u32 %s4527_s0, 4  ;;  %s4376_s26 = int_to_ptr.vmem [resolvable:$false] %s4375_s26 }
 0x4b6   : > { %s4377_s9 = scalar_lea.vmem %s4376_s26, 256  ;;  %p4378_p8 = scmp.lt.s32.totalorder %s3097_s11, %s4376_s26 }
 0x4b7   : > { %p4373_p5 = pnand %p4372_p13, %p5417_p12  ;;  %p4379_p0 = scmp.lt.s32.totalorder %s4377_s9, %s4371_s20 }
 0x4b9   : > { %s3094_s5 = scalar_lea.hbm %s5418_s18, %s3625_s24  ;;  %p4374_p10 = pneg %p4373_p5 }
 0x4ba   : > { %p4380_p9 = por %p4379_p0, %p4378_p8 }
 0x4bc   : > { %p4381_p1 = pnand %p4380_p9, %p4374_p10 }
 0x4be   : > { %4384 = shalt.err (!%p4381_p1)
}
 0x4bf   : > { %s4385_s15 = scalar_lea.hbm %s3094_s5, 128  ;;  %s4389_s23 = scalar_lea.hbm %s5418_s18, 256 }
 0x4c0   : > { %p4386_p4 = scmp.ne.s32.totalorder %s3094_s5, %s4385_s15  ;;  %p4390_p2 = scmp.lt.s32.totalorder %s3094_s5, %s5418_s18 }
 0x4c1   : > { %p4391_p3 = scmp.lt.s32.totalorder %s4389_s23, %s4385_s15 }
 0x4c2   : > { %p4387_p6 = pnand %p4386_p4, %p5417_p12 }
 0x4c3   : > { %p4392_p7 = por %p4391_p3, %p4390_p2 }
 0x4c4   : > { %p4388_p11 = pneg %p4387_p6 }
 0x4c6   : > { %p4393_p13 = pnand %p4392_p7, %p4388_p11 }
 0x4c8   : > { %4396 = shalt.err (!%p4393_p13)
}
 0x4c9   : > { %3690 = dma.vmem_to_hbm [thread:$0]  (%p5417_p12), %s3097_s11, 128, %s3094_s5, %s3069_s6  }
 0x4ca PF: > { %s5419_s14 = sld [smem:[#allocation24_spill]]  ;;  %p3706_p5 = scmp.ge.s32.totalorder %s4507_s7, 2 }
 0x4cb   : > { %s5420_s28 = sld [smem:[#allocation34_spill]] }
 0x4d0   : > { %s3108_s19 = sand.u32 1, %s5419_s14  }
 0x4d1   : > { %p5421_p10 = scmp.ne.s32.totalorder %s5420_s28, 0  ;;  %s3109_s8 = scalar_lea.sflag [#allocation5], %s3108_s19 }
 0x4d3   : > { %p3698_p8 = pnand %p3706_p5, %p5421_p10 }
 0x4d5   : > { %p3699_p0 = pneg %p3698_p8 }
 0x4d7   : > { %4458 = dma.done.wait (%p3699_p0), %s3109_s8, 32  }
 0x4d8   : > { %4460 = vsyncadd (%p3699_p0), %s3109_s8, 4294967264  ;;  %s3118_s12 = scalar_lea.sflag [#allocation14], %s3108_s19 }
 0x4d9   : > { %4462 = dma.done.wait (%p3699_p0), %s3118_s12, 128  }
 0x4da   : > { %4464 = vsyncadd (%p3699_p0), %s3118_s12, 4294967168  ;;  %s30_s7 = sadd.s32 1, %s4507_s7   ;;  %s5422_s10 = sld [smem:[#allocation25_spill]] }
 0x4db   : > { %p27_p9 = scmp.ge.s32.totalorder %s30_s7, 6   ;;  %s5423_s23 = sld [smem:[#allocation31_spill]] }
 0x4dc   : > { %s5424_s16 = sld [smem:[#allocation26_spill]]  ;;  %s5429_s21 = smov %s4471_s22 }
 0x4dd   : > { %s5425_s26 = sld [smem:[#allocation32_spill]]  ;;  %s5431_s24 = smov %s4483_s25 }
 0x4de   : > { %s5426_s27 = sld [smem:[#allocation28_spill]]  ;;  %s5433_s28 = smov %s4503_s30 }
 0x4df   : > { %s5427_s29 = sld [smem:[#allocation29_spill]] }
 0x4e0   : > { %s5428_s11 = sld [smem:[#allocation30_spill]]  ;;  %s5430_s22 = smov %s5422_s10 }
 0x4e2   : > { %s5432_s25 = smov %s5424_s16  ;;  %29 = sbr.rel (!%p27_p9) target bundleno = 20 (0x14), region = 155 }
 0x4e6   : > { %s5434_s30 = smov %s5428_s11 }
 0x4e7   :  { %3123 = vsyncpa [#allocation4], 1 }
 0x4e8   :  { %3125 = vsyncpa [#allocation4 + $0x1], 1 }
 0x4e9   :  { %3126 = vsyncpa [#allocation7], 1 }
 0x4ea   :  { %3128 = vsyncpa [#allocation7 + $0x1], 1 }
 0x4eb   :  { %3129 = vsyncpa [#allocation10], 1 }
 0x4ec   :  { %3131 = vsyncpa [#allocation10 + $0x1], 1 }
 0x4ed   :  { %3132 = vsyncpa [#allocation5], 1 }
 0x4ee   :  { %3134 = vsyncpa [#allocation5 + $0x1], 1 }
 0x4ef   :  { %3135 = vsyncpa [#allocation14], 1 }
 0x4f0   :  { %3137 = vsyncpa [#allocation14 + $0x1], 1 }

</bundles_post_ra>
